<compile_context>
chip_gen: v7x
topology: tpu7x:2x2x1
jax: 0.10.0
libtpu: 0.0.40
codegen_flags: <defaults>
</compile_context>

<pallas_src>
import functools
import math

import jax
import jax.numpy as jnp
from jax.experimental import pallas as pl
from jax.experimental.pallas import tpu as pltpu

_OUT_PAD = 128  # lane-dense padded width of the fused head output


# ----------------------------- fused Pallas kernel ---------------------------

def _char_det_kernel(
    patches_ref, patch_w_ref, embed_b_ref,
    ln1_g_ref, ln1_b_ref, wqkv_ref, bqkv_ref, wo_ref, bo_ref, rel_bias_ref,
    ln2_g_ref, ln2_b_ref, w_mlp1_ref, b_mlp1_ref, w_mlp2_ref, b_mlp2_ref,
    ln_f_g_ref, ln_f_b_ref, head_w1_ref, head_b1_ref, head_w2_ref, head_b2_ref,
    out_ref,
    *, num_layers, num_heads, head_dim, hidden, ln_eps):
  """Whole ViT forward for one image; everything resident in VMEM."""

  def layernorm(x, g, b):            # f32 statistics (v5e-safe)
    mu = jnp.mean(x, axis=-1, keepdims=True)
    var = jnp.mean((x - mu) ** 2, axis=-1, keepdims=True)
    return (x - mu) * jax.lax.rsqrt(var + ln_eps) * g + b

  def linear(x, w_bf16, b_f32):      # bf16 MXU operands, f32 accumulation
    y = jnp.dot(x.astype(jnp.bfloat16), w_bf16, preferred_element_type=jnp.float32)
    return y + b_f32

  scale = 1.0 / math.sqrt(head_dim)

  # --- patch embedding (+ folded conv-bias / CLS token / positional embedding) ---
  x = jnp.dot(patches_ref[0], patch_w_ref[...],
              preferred_element_type=jnp.float32) + embed_b_ref[...]     # (N, H) f32

  # --- transformer encoder (pre-LN ViT blocks), unrolled over layers ---
  for l in range(num_layers):
    h1 = layernorm(x, ln1_g_ref[l], ln1_b_ref[l])
    qkv = linear(h1, wqkv_ref[l], bqkv_ref[l])                           # (N, 3H) f32
    wo_l = wo_ref[l]                                                     # (H, H) bf16
    attn = bo_ref[l]                                                     # start from bias
    for h in range(num_heads):
      lo = h * head_dim
      q = qkv[:, lo:lo + head_dim]
      k = qkv[:, hidden + lo:hidden + lo + head_dim]
      v = qkv[:, 2 * hidden + lo:2 * hidden + lo + head_dim]
      # q @ k^T without transposing k (contract last dims)
      s = jax.lax.dot_general(
          q.astype(jnp.bfloat16), k.astype(jnp.bfloat16),
          dimension_numbers=(((1,), (1,)), ((), ())),
          preferred_element_type=jnp.float32) * scale
      s = s + rel_bias_ref[l, h]                                         # relative pos bias
      s = s - jnp.max(s, axis=-1, keepdims=True)
      p = jnp.exp(s)                                                     # f32 softmax
      inv = pl.reciprocal(jnp.sum(p, axis=-1, keepdims=True), approx=True)
      ctx = jnp.dot(p.astype(jnp.bfloat16), v.astype(jnp.bfloat16),
                    preferred_element_type=jnp.float32) * inv            # (N, dh)
      # per-head row-slice of W_o  ==  concat(heads) @ W_o
      attn = attn + jnp.dot(ctx.astype(jnp.bfloat16), wo_l[lo:lo + head_dim, :],
                            preferred_element_type=jnp.float32)
    x = x + attn

    h2 = layernorm(x, ln2_g_ref[l], ln2_b_ref[l])
    m = linear(h2, w_mlp1_ref[l], b_mlp1_ref[l])
    m = 0.5 * m * (1.0 + jax.lax.erf(m * (1.0 / math.sqrt(2.0))))        # exact GELU, f32
    m = linear(m, w_mlp2_ref[l], b_mlp2_ref[l])
    x = x + m

  feat = layernorm(x, ln_f_g_ref[...], ln_f_b_ref[...])

  # --- fused detection + classification heads (Dropout is identity at inference) ---
  hid = jnp.maximum(linear(feat, head_w1_ref[...], head_b1_ref[...]), 0.0)
  out_ref[0] = linear(hid, head_w2_ref[...], head_b2_ref[...]).astype(out_ref.dtype)


# --------------------------- parameter construction --------------------------

def init_params(key, config):
  m = config["model"]
  H = m["hidden_size"]
  heads = m["num_heads"]
  L = m["num_layers"]
  patch = m["patch_size"]
  img = m["input_size"][0]
  P = (img // patch) ** 2
  N = P + 1
  MH = H * m["mlp_ratio"]
  C = m["num_classes"]
  Cin = 3 * patch * patch

  def rnd(k, shape):
    return 0.02 * jax.random.normal(k, shape, dtype=jnp.float32)

  ks = iter(jax.random.split(key, 16))

  patch_w = rnd(next(ks), (Cin, H))
  patch_b = jnp.zeros((H,), jnp.float32)
  cls_token = rnd(next(ks), (1, H))
  pos_embed = rnd(next(ks), (N, H))
  # Fold conv bias + CLS token + positional embedding into one additive [N, H] term; the
  # kernel's patch matmul (with a zero "virtual patch" at row 0) then yields the token matrix.
  embed_b = jnp.concatenate(
      [cls_token + pos_embed[:1], patch_b[None, :] + pos_embed[1:]], axis=0)

  # Transformer layers stacked along a leading L axis; q/k/v fused into one [H, 3H] weight.
  wqkv = rnd(next(ks), (L, H, 3 * H))
  wo = rnd(next(ks), (L, H, H))
  # use_relative_position_bias=True: learned per-head additive bias on the attention logits,
  # parametrized directly as [L, heads, N, N] (synthetic weights; a checkpoint would gather
  # this from a relative-distance table).
  rel_bias = rnd(next(ks), (L, heads, N, N))
  w_mlp1 = rnd(next(ks), (L, H, MH))
  w_mlp2 = rnd(next(ks), (L, MH, H))

  # Heads: both first Linear(H,H)+ReLU fused into [H, 2H]; the two second linears packed
  # block-diagonally into a lane-dense [2H, 128] weight (cols 0:5 det, 5:5+C cls, rest zero).
  det_w1, det_w2 = rnd(next(ks), (H, H)), rnd(next(ks), (H, 5))
  cls_w1, cls_w2 = rnd(next(ks), (H, H)), rnd(next(ks), (H, C))
  head_w1 = jnp.concatenate([det_w1, cls_w1], axis=1)
  head_b1 = jnp.zeros((1, 2 * H), jnp.float32)
  head_w2 = jnp.zeros((2 * H, _OUT_PAD), jnp.float32)
  head_w2 = head_w2.at[:H, :5].set(det_w2)
  head_w2 = head_w2.at[H:, 5:5 + C].set(cls_w2)
  head_b2 = jnp.zeros((1, _OUT_PAD), jnp.float32)

  bf16 = jnp.bfloat16
  return {
      "patch_w": patch_w.astype(bf16),
      "embed_b": embed_b,                                   # f32
      "ln1_g": jnp.ones((L, 1, H), jnp.float32),
      "ln1_b": jnp.zeros((L, 1, H), jnp.float32),
      "wqkv": wqkv.astype(bf16),
      "bqkv": jnp.zeros((L, 1, 3 * H), jnp.float32),
      "wo": wo.astype(bf16),
      "bo": jnp.zeros((L, 1, H), jnp.float32),
      "rel_bias": rel_bias,                                 # f32
      "ln2_g": jnp.ones((L, 1, H), jnp.float32),
      "ln2_b": jnp.zeros((L, 1, H), jnp.float32),
      "w_mlp1": w_mlp1.astype(bf16),
      "b_mlp1": jnp.zeros((L, 1, MH), jnp.float32),
      "w_mlp2": w_mlp2.astype(bf16),
      "b_mlp2": jnp.zeros((L, 1, H), jnp.float32),
      "ln_f_g": jnp.ones((1, H), jnp.float32),
      "ln_f_b": jnp.zeros((1, H), jnp.float32),
      "head_w1": head_w1.astype(bf16),
      "head_b1": head_b1,
      "head_w2": head_w2.astype(bf16),
      "head_b2": head_b2,
  }


# ------------------------------- forward pass --------------------------------

def character_detection_forward(images, params, config):
  m = config["model"]
  patch = m["patch_size"]
  hidden = m["hidden_size"]
  heads = m["num_heads"]
  dh = hidden // heads
  L = m["num_layers"]
  C = m["num_classes"]

  B, Cch, Himg, Wimg = images.shape
  nH, nW = Himg // patch, Wimg // patch     # input matches configured size -> no pos interp
  P = nH * nW
  N = P + 1
  Cin = Cch * patch * patch

  # im2col (plain-JAX glue): Conv2d(kernel=stride=patch) -> channel-major patch flattening
  # (matches torch Conv2d weight layout), plus a zero "virtual patch" row for the CLS slot.
  patches = images.reshape(B, Cch, nH, patch, nW, patch)
  patches = patches.transpose(0, 2, 4, 1, 3, 5).reshape(B, P, Cin)
  patches = jnp.concatenate([jnp.zeros((B, 1, Cin), images.dtype), patches], axis=1)
  patches = patches.astype(jnp.bfloat16)    # bf16 MXU operand

  kernel = functools.partial(
      _char_det_kernel, num_layers=L, num_heads=heads, head_dim=dh,
      hidden=hidden, ln_eps=1e-12)

  weight_names = ["patch_w", "embed_b", "ln1_g", "ln1_b", "wqkv", "bqkv", "wo",
                  "bo", "rel_bias", "ln2_g", "ln2_b", "w_mlp1", "b_mlp1",
                  "w_mlp2", "b_mlp2", "ln_f_g", "ln_f_b", "head_w1", "head_b1",
                  "head_w2", "head_b2"]
  weights = [params[k] for k in weight_names]

  def _const_map(ndim):
    return lambda b: (0,) * ndim

  in_specs = [pl.BlockSpec((1, N, Cin), lambda b: (b, 0, 0))]
  in_specs += [pl.BlockSpec(w.shape, _const_map(w.ndim)) for w in weights]

  out = pl.pallas_call(
      kernel,
      out_shape=jax.ShapeDtypeStruct((B, N, _OUT_PAD), jnp.float32),
      grid=(B,),
      in_specs=in_specs,
      out_specs=pl.BlockSpec((1, N, _OUT_PAD), lambda b: (b, 0, 0)),
      compiler_params=pltpu.CompilerParams(
          dimension_semantics=("parallel",)),
  )(patches, *weights)

  det = out[..., :5]                         # [B, N, 5]
  cls_logits = out[..., 5:5 + C]             # [B, N, C]

  # dense post-process (inference branch)
  boxes = det[..., :4]
  scores = jax.nn.sigmoid(det[..., 4])
  labels = jnp.argmax(cls_logits, axis=-1)
  conf_mask = scores > m["confidence_threshold"]
  # TODO(synk): per-image ragged filtering by conf_mask and the NMS while-loop are
  # data-dependent-shape ops; returned densely instead.
  return {
      "boxes": boxes,
      "scores": scores,
      "labels": labels,
      "conf_mask": conf_mask,
      "detection": det,
      "classification": cls_logits,
  }


# ---------------------------------- main --------------------------------------

if __name__ == "__main__":
  config = {
      "model": {
          "input_size": [32, 32],
          "patch_size": 8,
          "num_heads": 2,
          "num_layers": 2,
          "hidden_size": 32,
          "mlp_ratio": 4,
          "dropout": 0.0,
          "attention_dropout": 0.0,
          "num_classes": 7,
          "confidence_threshold": 0.5,
          "nms_threshold": 0.5,
      }
  }

  key = jax.random.PRNGKey(0)
  pkey, xkey = jax.random.split(key)
  params = init_params(pkey, config)
  images = jax.random.normal(xkey, (2, 3, 32, 32), dtype=jnp.float32)   # [B, C, H, W]

  out = character_detection_forward(images, params, config)
  jax.block_until_ready(out["boxes"])
  jax.block_until_ready(out["scores"])
  jax.block_until_ready(out["labels"])

  assert out["boxes"].shape == (2, 17, 4)
  assert out["scores"].shape == (2, 17)
  assert out["labels"].shape == (2, 17)
  assert out["classification"].shape == (2, 17, 7)
  print("KERNEL_OK")
</pallas_src>

<mosaic_0001>
module attributes {stable_mosaic.version = 11 : i64} {
  func.func @_char_det_kernel(%arg0: i32, %arg1: memref<1x17x192xbf16, #tpu.memory_space<vmem>>, %arg2: memref<192x32xbf16, #tpu.memory_space<vmem>>, %arg3: memref<17x32xf32, #tpu.memory_space<vmem>>, %arg4: memref<2x1x32xf32, #tpu.memory_space<vmem>>, %arg5: memref<2x1x32xf32, #tpu.memory_space<vmem>>, %arg6: memref<2x32x96xbf16, #tpu.memory_space<vmem>>, %arg7: memref<2x1x96xf32, #tpu.memory_space<vmem>>, %arg8: memref<2x32x32xbf16, #tpu.memory_space<vmem>>, %arg9: memref<2x1x32xf32, #tpu.memory_space<vmem>>, %arg10: memref<2x2x17x17xf32, #tpu.memory_space<vmem>>, %arg11: memref<2x1x32xf32, #tpu.memory_space<vmem>>, %arg12: memref<2x1x32xf32, #tpu.memory_space<vmem>>, %arg13: memref<2x32x128xbf16, #tpu.memory_space<vmem>>, %arg14: memref<2x1x128xf32, #tpu.memory_space<vmem>>, %arg15: memref<2x128x32xbf16, #tpu.memory_space<vmem>>, %arg16: memref<2x1x32xf32, #tpu.memory_space<vmem>>, %arg17: memref<1x32xf32, #tpu.memory_space<vmem>>, %arg18: memref<1x32xf32, #tpu.memory_space<vmem>>, %arg19: memref<32x64xbf16, #tpu.memory_space<vmem>>, %arg20: memref<1x64xf32, #tpu.memory_space<vmem>>, %arg21: memref<64x128xbf16, #tpu.memory_space<vmem>>, %arg22: memref<1x128xf32, #tpu.memory_space<vmem>>, %arg23: memref<1x17x128xf32, #tpu.memory_space<vmem>>) attributes {dimension_semantics = [#tpu.dimension_semantics<parallel>], iteration_bounds = array<i64: 2>, scalar_prefetch = 0 : i64, scratch_operands = 0 : i64, tpu.core_type = #tpu.core_type<tc>, window_params = [{transform_indices = @transform_0, window_bounds = array<i64: 1, 17, 192>}, {pipeline_mode = #tpu.pipeline_mode<synchronous>, transform_indices = @transform_1, window_bounds = array<i64: 192, 32>}, {pipeline_mode = #tpu.pipeline_mode<synchronous>, transform_indices = @transform_2, window_bounds = array<i64: 17, 32>}, {pipeline_mode = #tpu.pipeline_mode<synchronous>, transform_indices = @transform_3, window_bounds = array<i64: 2, 1, 32>}, {pipeline_mode = #tpu.pipeline_mode<synchronous>, transform_indices = @transform_4, window_bounds = array<i64: 2, 1, 32>}, {pipeline_mode = #tpu.pipeline_mode<synchronous>, transform_indices = @transform_5, window_bounds = array<i64: 2, 32, 96>}, {pipeline_mode = #tpu.pipeline_mode<synchronous>, transform_indices = @transform_6, window_bounds = array<i64: 2, 1, 96>}, {pipeline_mode = #tpu.pipeline_mode<synchronous>, transform_indices = @transform_7, window_bounds = array<i64: 2, 32, 32>}, {pipeline_mode = #tpu.pipeline_mode<synchronous>, transform_indices = @transform_8, window_bounds = array<i64: 2, 1, 32>}, {pipeline_mode = #tpu.pipeline_mode<synchronous>, transform_indices = @transform_9, window_bounds = array<i64: 2, 2, 17, 17>}, {pipeline_mode = #tpu.pipeline_mode<synchronous>, transform_indices = @transform_10, window_bounds = array<i64: 2, 1, 32>}, {pipeline_mode = #tpu.pipeline_mode<synchronous>, transform_indices = @transform_11, window_bounds = array<i64: 2, 1, 32>}, {pipeline_mode = #tpu.pipeline_mode<synchronous>, transform_indices = @transform_12, window_bounds = array<i64: 2, 32, 128>}, {pipeline_mode = #tpu.pipeline_mode<synchronous>, transform_indices = @transform_13, window_bounds = array<i64: 2, 1, 128>}, {pipeline_mode = #tpu.pipeline_mode<synchronous>, transform_indices = @transform_14, window_bounds = array<i64: 2, 128, 32>}, {pipeline_mode = #tpu.pipeline_mode<synchronous>, transform_indices = @transform_15, window_bounds = array<i64: 2, 1, 32>}, {pipeline_mode = #tpu.pipeline_mode<synchronous>, transform_indices = @transform_16, window_bounds = array<i64: 1, 32>}, {pipeline_mode = #tpu.pipeline_mode<synchronous>, transform_indices = @transform_17, window_bounds = array<i64: 1, 32>}, {pipeline_mode = #tpu.pipeline_mode<synchronous>, transform_indices = @transform_18, window_bounds = array<i64: 32, 64>}, {pipeline_mode = #tpu.pipeline_mode<synchronous>, transform_indices = @transform_19, window_bounds = array<i64: 1, 64>}, {pipeline_mode = #tpu.pipeline_mode<synchronous>, transform_indices = @transform_20, window_bounds = array<i64: 64, 128>}, {pipeline_mode = #tpu.pipeline_mode<synchronous>, transform_indices = @transform_21, window_bounds = array<i64: 1, 128>}, {transform_indices = @transform_22, window_bounds = array<i64: 1, 17, 128>}]} {
    %c0 = arith.constant 0 : index
    %c0_0 = arith.constant 0 : index
    %c0_1 = arith.constant 0 : index
    %0 = vector.load %arg1[%c0, %c0_0, %c0_1] : memref<1x17x192xbf16, #tpu.memory_space<vmem>>, vector<1x17x192xbf16>
    %1 = vector.shape_cast %0 : vector<1x17x192xbf16> to vector<17x192xbf16>
    %c0_2 = arith.constant 0 : index
    %c0_3 = arith.constant 0 : index
    %2 = vector.load %arg2[%c0_2, %c0_3] : memref<192x32xbf16, #tpu.memory_space<vmem>>, vector<192x32xbf16>
    %cst = arith.constant dense<0.000000e+00> : vector<17x32xf32>
    %3 = tpu.matmul %1, %2, %cst {dimension_numbers = #tpu.dot_dimension_numbers<[1], [0], [0], [1], [0, 0, 1, 1], [], []>} : vector<17x192xbf16>, vector<192x32xbf16>, vector<17x32xf32> -> vector<17x32xf32>
    %c0_4 = arith.constant 0 : index
    %c0_5 = arith.constant 0 : index
    %4 = vector.load %arg3[%c0_4, %c0_5] : memref<17x32xf32, #tpu.memory_space<vmem>>, vector<17x32xf32>
    %5 = arith.addf %3, %4 : vector<17x32xf32>
    %c0_6 = arith.constant 0 : index
    %c0_7 = arith.constant 0 : index
    %c0_8 = arith.constant 0 : index
    %6 = vector.load %arg4[%c0_6, %c0_7, %c0_8] : memref<2x1x32xf32, #tpu.memory_space<vmem>>, vector<1x1x32xf32>
    %7 = vector.shape_cast %6 : vector<1x1x32xf32> to vector<1x32xf32>
    %c0_9 = arith.constant 0 : index
    %c0_10 = arith.constant 0 : index
    %c0_11 = arith.constant 0 : index
    %8 = vector.load %arg5[%c0_9, %c0_10, %c0_11] : memref<2x1x32xf32, #tpu.memory_space<vmem>>, vector<1x1x32xf32>
    %9 = vector.shape_cast %8 : vector<1x1x32xf32> to vector<1x32xf32>
    %cst_12 = arith.constant dense<0.000000e+00> : vector<17xf32>
    %10 = vector.multi_reduction <add>, %5, %cst_12 [1] : vector<17x32xf32> to vector<17xf32>
    %11 = vector.shape_cast %10 : vector<17xf32> to vector<17x1xf32>
    %cst_13 = arith.constant 3.200000e+01 : f32
    %12 = vector.broadcast %cst_13 : f32 to vector<17x1xf32>
    %13 = arith.divf %11, %12 : vector<17x1xf32>
    %14 = vector.broadcast %13 : vector<17x1xf32> to vector<17x32xf32>
    %15 = arith.subf %5, %14 : vector<17x32xf32>
    %16 = arith.mulf %15, %15 : vector<17x32xf32>
    %cst_14 = arith.constant dense<0.000000e+00> : vector<17xf32>
    %17 = vector.multi_reduction <add>, %16, %cst_14 [1] : vector<17x32xf32> to vector<17xf32>
    %18 = vector.shape_cast %17 : vector<17xf32> to vector<17x1xf32>
    %cst_15 = arith.constant 3.200000e+01 : f32
    %19 = vector.broadcast %cst_15 : f32 to vector<17x1xf32>
    %20 = arith.divf %18, %19 : vector<17x1xf32>
    %21 = vector.broadcast %13 : vector<17x1xf32> to vector<17x32xf32>
    %22 = arith.subf %5, %21 : vector<17x32xf32>
    %cst_16 = arith.constant 9.99999996E-13 : f32
    %23 = vector.broadcast %cst_16 : f32 to vector<17x1xf32>
    %24 = arith.addf %20, %23 : vector<17x1xf32>
    %25 = math.rsqrt %24 : vector<17x1xf32>
    %26 = vector.broadcast %25 : vector<17x1xf32> to vector<17x32xf32>
    %27 = arith.mulf %22, %26 : vector<17x32xf32>
    %28 = vector.broadcast %7 : vector<1x32xf32> to vector<17x32xf32>
    %29 = arith.mulf %27, %28 : vector<17x32xf32>
    %30 = vector.broadcast %9 : vector<1x32xf32> to vector<17x32xf32>
    %31 = arith.addf %29, %30 : vector<17x32xf32>
    %c0_17 = arith.constant 0 : index
    %c0_18 = arith.constant 0 : index
    %c0_19 = arith.constant 0 : index
    %32 = vector.load %arg6[%c0_17, %c0_18, %c0_19] : memref<2x32x96xbf16, #tpu.memory_space<vmem>>, vector<1x32x96xbf16>
    %33 = vector.shape_cast %32 : vector<1x32x96xbf16> to vector<32x96xbf16>
    %c0_20 = arith.constant 0 : index
    %c0_21 = arith.constant 0 : index
    %c0_22 = arith.constant 0 : index
    %34 = vector.load %arg7[%c0_20, %c0_21, %c0_22] : memref<2x1x96xf32, #tpu.memory_space<vmem>>, vector<1x1x96xf32>
    %35 = vector.shape_cast %34 : vector<1x1x96xf32> to vector<1x96xf32>
    %36 = arith.truncf %31 : vector<17x32xf32> to vector<17x32xbf16>
    %cst_23 = arith.constant dense<0.000000e+00> : vector<17x96xf32>
    %37 = tpu.matmul %36, %33, %cst_23 {dimension_numbers = #tpu.dot_dimension_numbers<[1], [0], [0], [1], [0, 0, 1, 1], [], []>} : vector<17x32xbf16>, vector<32x96xbf16>, vector<17x96xf32> -> vector<17x96xf32>
    %38 = vector.broadcast %35 : vector<1x96xf32> to vector<17x96xf32>
    %39 = arith.addf %37, %38 : vector<17x96xf32>
    %c0_24 = arith.constant 0 : index
    %c0_25 = arith.constant 0 : index
    %c0_26 = arith.constant 0 : index
    %40 = vector.load %arg8[%c0_24, %c0_25, %c0_26] : memref<2x32x32xbf16, #tpu.memory_space<vmem>>, vector<1x32x32xbf16>
    %41 = vector.shape_cast %40 : vector<1x32x32xbf16> to vector<32x32xbf16>
    %c0_27 = arith.constant 0 : index
    %c0_28 = arith.constant 0 : index
    %c0_29 = arith.constant 0 : index
    %42 = vector.load %arg9[%c0_27, %c0_28, %c0_29] : memref<2x1x32xf32, #tpu.memory_space<vmem>>, vector<1x1x32xf32>
    %43 = vector.shape_cast %42 : vector<1x1x32xf32> to vector<1x32xf32>
    %44 = vector.extract_strided_slice %39 {offsets = [0, 0], sizes = [17, 16], strides = [1, 1]} : vector<17x96xf32> to vector<17x16xf32>
    %45 = vector.extract_strided_slice %39 {offsets = [0, 32], sizes = [17, 16], strides = [1, 1]} : vector<17x96xf32> to vector<17x16xf32>
    %46 = vector.extract_strided_slice %39 {offsets = [0, 64], sizes = [17, 16], strides = [1, 1]} : vector<17x96xf32> to vector<17x16xf32>
    %47 = arith.truncf %44 : vector<17x16xf32> to vector<17x16xbf16>
    %48 = arith.truncf %45 : vector<17x16xf32> to vector<17x16xbf16>
    %cst_30 = arith.constant dense<0.000000e+00> : vector<17x17xf32>
    %49 = tpu.matmul %47, %48, %cst_30 {dimension_numbers = #tpu.dot_dimension_numbers<[1], [1], [0], [0], [0, 0, 1, 0], [], []>} : vector<17x16xbf16>, vector<17x16xbf16>, vector<17x17xf32> -> vector<17x17xf32>
    %cst_31 = arith.constant 2.500000e-01 : f32
    %50 = vector.broadcast %cst_31 : f32 to vector<17x17xf32>
    %51 = arith.mulf %49, %50 : vector<17x17xf32>
    %c0_32 = arith.constant 0 : index
    %c0_33 = arith.constant 0 : index
    %c0_34 = arith.constant 0 : index
    %c0_35 = arith.constant 0 : index
    %52 = vector.load %arg10[%c0_32, %c0_33, %c0_34, %c0_35] : memref<2x2x17x17xf32, #tpu.memory_space<vmem>>, vector<1x1x17x17xf32>
    %53 = vector.shape_cast %52 : vector<1x1x17x17xf32> to vector<17x17xf32>
    %54 = arith.addf %51, %53 : vector<17x17xf32>
    %cst_36 = arith.constant dense<0xFF800000> : vector<17xf32>
    %55 = vector.multi_reduction <maximumf>, %54, %cst_36 [1] : vector<17x17xf32> to vector<17xf32>
    %56 = vector.shape_cast %55 : vector<17xf32> to vector<17x1xf32>
    %57 = vector.broadcast %56 : vector<17x1xf32> to vector<17x17xf32>
    %58 = arith.subf %54, %57 : vector<17x17xf32>
    %59 = math.exp %58 : vector<17x17xf32>
    %cst_37 = arith.constant dense<0.000000e+00> : vector<17xf32>
    %60 = vector.multi_reduction <add>, %59, %cst_37 [1] : vector<17x17xf32> to vector<17xf32>
    %61 = vector.shape_cast %60 : vector<17xf32> to vector<17x1xf32>
    %62 = tpu.reciprocal %61 {approx = true} : vector<17x1xf32> -> vector<17x1xf32>
    %63 = arith.truncf %59 : vector<17x17xf32> to vector<17x17xbf16>
    %64 = arith.truncf %46 : vector<17x16xf32> to vector<17x16xbf16>
    %cst_38 = arith.constant dense<0.000000e+00> : vector<17x16xf32>
    %65 = tpu.matmul %63, %64, %cst_38 {dimension_numbers = #tpu.dot_dimension_numbers<[1], [0], [0], [1], [0, 0, 1, 1], [], []>} : vector<17x17xbf16>, vector<17x16xbf16>, vector<17x16xf32> -> vector<17x16xf32>
    %66 = vector.broadcast %62 : vector<17x1xf32> to vector<17x16xf32>
    %67 = arith.mulf %65, %66 : vector<17x16xf32>
    %68 = arith.truncf %67 : vector<17x16xf32> to vector<17x16xbf16>
    %69 = vector.extract_strided_slice %41 {offsets = [0, 0], sizes = [16, 32], strides = [1, 1]} : vector<32x32xbf16> to vector<16x32xbf16>
    %cst_39 = arith.constant dense<0.000000e+00> : vector<17x32xf32>
    %70 = tpu.matmul %68, %69, %cst_39 {dimension_numbers = #tpu.dot_dimension_numbers<[1], [0], [0], [1], [0, 0, 1, 1], [], []>} : vector<17x16xbf16>, vector<16x32xbf16>, vector<17x32xf32> -> vector<17x32xf32>
    %71 = vector.broadcast %43 : vector<1x32xf32> to vector<17x32xf32>
    %72 = arith.addf %71, %70 : vector<17x32xf32>
    %73 = vector.extract_strided_slice %39 {offsets = [0, 16], sizes = [17, 16], strides = [1, 1]} : vector<17x96xf32> to vector<17x16xf32>
    %74 = vector.extract_strided_slice %39 {offsets = [0, 48], sizes = [17, 16], strides = [1, 1]} : vector<17x96xf32> to vector<17x16xf32>
    %75 = vector.extract_strided_slice %39 {offsets = [0, 80], sizes = [17, 16], strides = [1, 1]} : vector<17x96xf32> to vector<17x16xf32>
    %76 = arith.truncf %73 : vector<17x16xf32> to vector<17x16xbf16>
    %77 = arith.truncf %74 : vector<17x16xf32> to vector<17x16xbf16>
    %cst_40 = arith.constant dense<0.000000e+00> : vector<17x17xf32>
    %78 = tpu.matmul %76, %77, %cst_40 {dimension_numbers = #tpu.dot_dimension_numbers<[1], [1], [0], [0], [0, 0, 1, 0], [], []>} : vector<17x16xbf16>, vector<17x16xbf16>, vector<17x17xf32> -> vector<17x17xf32>
    %cst_41 = arith.constant 2.500000e-01 : f32
    %79 = vector.broadcast %cst_41 : f32 to vector<17x17xf32>
    %80 = arith.mulf %78, %79 : vector<17x17xf32>
    %c0_42 = arith.constant 0 : index
    %c1 = arith.constant 1 : index
    %c0_43 = arith.constant 0 : index
    %c0_44 = arith.constant 0 : index
    %81 = vector.load %arg10[%c0_42, %c1, %c0_43, %c0_44] : memref<2x2x17x17xf32, #tpu.memory_space<vmem>>, vector<1x1x17x17xf32>
    %82 = vector.shape_cast %81 : vector<1x1x17x17xf32> to vector<17x17xf32>
    %83 = arith.addf %80, %82 : vector<17x17xf32>
    %cst_45 = arith.constant dense<0xFF800000> : vector<17xf32>
    %84 = vector.multi_reduction <maximumf>, %83, %cst_45 [1] : vector<17x17xf32> to vector<17xf32>
    %85 = vector.shape_cast %84 : vector<17xf32> to vector<17x1xf32>
    %86 = vector.broadcast %85 : vector<17x1xf32> to vector<17x17xf32>
    %87 = arith.subf %83, %86 : vector<17x17xf32>
    %88 = math.exp %87 : vector<17x17xf32>
    %cst_46 = arith.constant dense<0.000000e+00> : vector<17xf32>
    %89 = vector.multi_reduction <add>, %88, %cst_46 [1] : vector<17x17xf32> to vector<17xf32>
    %90 = vector.shape_cast %89 : vector<17xf32> to vector<17x1xf32>
    %91 = tpu.reciprocal %90 {approx = true} : vector<17x1xf32> -> vector<17x1xf32>
    %92 = arith.truncf %88 : vector<17x17xf32> to vector<17x17xbf16>
    %93 = arith.truncf %75 : vector<17x16xf32> to vector<17x16xbf16>
    %cst_47 = arith.constant dense<0.000000e+00> : vector<17x16xf32>
    %94 = tpu.matmul %92, %93, %cst_47 {dimension_numbers = #tpu.dot_dimension_numbers<[1], [0], [0], [1], [0, 0, 1, 1], [], []>} : vector<17x17xbf16>, vector<17x16xbf16>, vector<17x16xf32> -> vector<17x16xf32>
    %95 = vector.broadcast %91 : vector<17x1xf32> to vector<17x16xf32>
    %96 = arith.mulf %94, %95 : vector<17x16xf32>
    %97 = arith.truncf %96 : vector<17x16xf32> to vector<17x16xbf16>
    %98 = vector.extract_strided_slice %41 {offsets = [16, 0], sizes = [16, 32], strides = [1, 1]} : vector<32x32xbf16> to vector<16x32xbf16>
    %cst_48 = arith.constant dense<0.000000e+00> : vector<17x32xf32>
    %99 = tpu.matmul %97, %98, %cst_48 {dimension_numbers = #tpu.dot_dimension_numbers<[1], [0], [0], [1], [0, 0, 1, 1], [], []>} : vector<17x16xbf16>, vector<16x32xbf16>, vector<17x32xf32> -> vector<17x32xf32>
    %100 = arith.addf %72, %99 : vector<17x32xf32>
    %101 = arith.addf %5, %100 : vector<17x32xf32>
    %c0_49 = arith.constant 0 : index
    %c0_50 = arith.constant 0 : index
    %c0_51 = arith.constant 0 : index
    %102 = vector.load %arg11[%c0_49, %c0_50, %c0_51] : memref<2x1x32xf32, #tpu.memory_space<vmem>>, vector<1x1x32xf32>
    %103 = vector.shape_cast %102 : vector<1x1x32xf32> to vector<1x32xf32>
    %c0_52 = arith.constant 0 : index
    %c0_53 = arith.constant 0 : index
    %c0_54 = arith.constant 0 : index
    %104 = vector.load %arg12[%c0_52, %c0_53, %c0_54] : memref<2x1x32xf32, #tpu.memory_space<vmem>>, vector<1x1x32xf32>
    %105 = vector.shape_cast %104 : vector<1x1x32xf32> to vector<1x32xf32>
    %cst_55 = arith.constant dense<0.000000e+00> : vector<17xf32>
    %106 = vector.multi_reduction <add>, %101, %cst_55 [1] : vector<17x32xf32> to vector<17xf32>
    %107 = vector.shape_cast %106 : vector<17xf32> to vector<17x1xf32>
    %cst_56 = arith.constant 3.200000e+01 : f32
    %108 = vector.broadcast %cst_56 : f32 to vector<17x1xf32>
    %109 = arith.divf %107, %108 : vector<17x1xf32>
    %110 = vector.broadcast %109 : vector<17x1xf32> to vector<17x32xf32>
    %111 = arith.subf %101, %110 : vector<17x32xf32>
    %112 = arith.mulf %111, %111 : vector<17x32xf32>
    %cst_57 = arith.constant dense<0.000000e+00> : vector<17xf32>
    %113 = vector.multi_reduction <add>, %112, %cst_57 [1] : vector<17x32xf32> to vector<17xf32>
    %114 = vector.shape_cast %113 : vector<17xf32> to vector<17x1xf32>
    %cst_58 = arith.constant 3.200000e+01 : f32
    %115 = vector.broadcast %cst_58 : f32 to vector<17x1xf32>
    %116 = arith.divf %114, %115 : vector<17x1xf32>
    %117 = vector.broadcast %109 : vector<17x1xf32> to vector<17x32xf32>
    %118 = arith.subf %101, %117 : vector<17x32xf32>
    %cst_59 = arith.constant 9.99999996E-13 : f32
    %119 = vector.broadcast %cst_59 : f32 to vector<17x1xf32>
    %120 = arith.addf %116, %119 : vector<17x1xf32>
    %121 = math.rsqrt %120 : vector<17x1xf32>
    %122 = vector.broadcast %121 : vector<17x1xf32> to vector<17x32xf32>
    %123 = arith.mulf %118, %122 : vector<17x32xf32>
    %124 = vector.broadcast %103 : vector<1x32xf32> to vector<17x32xf32>
    %125 = arith.mulf %123, %124 : vector<17x32xf32>
    %126 = vector.broadcast %105 : vector<1x32xf32> to vector<17x32xf32>
    %127 = arith.addf %125, %126 : vector<17x32xf32>
    %c0_60 = arith.constant 0 : index
    %c0_61 = arith.constant 0 : index
    %c0_62 = arith.constant 0 : index
    %128 = vector.load %arg13[%c0_60, %c0_61, %c0_62] : memref<2x32x128xbf16, #tpu.memory_space<vmem>>, vector<1x32x128xbf16>
    %129 = vector.shape_cast %128 : vector<1x32x128xbf16> to vector<32x128xbf16>
    %c0_63 = arith.constant 0 : index
    %c0_64 = arith.constant 0 : index
    %c0_65 = arith.constant 0 : index
    %130 = vector.load %arg14[%c0_63, %c0_64, %c0_65] : memref<2x1x128xf32, #tpu.memory_space<vmem>>, vector<1x1x128xf32>
    %131 = vector.shape_cast %130 : vector<1x1x128xf32> to vector<1x128xf32>
    %132 = arith.truncf %127 : vector<17x32xf32> to vector<17x32xbf16>
    %cst_66 = arith.constant dense<0.000000e+00> : vector<17x128xf32>
    %133 = tpu.matmul %132, %129, %cst_66 {dimension_numbers = #tpu.dot_dimension_numbers<[1], [0], [0], [1], [0, 0, 1, 1], [], []>} : vector<17x32xbf16>, vector<32x128xbf16>, vector<17x128xf32> -> vector<17x128xf32>
    %134 = vector.broadcast %131 : vector<1x128xf32> to vector<17x128xf32>
    %135 = arith.addf %133, %134 : vector<17x128xf32>
    %cst_67 = arith.constant 5.000000e-01 : f32
    %136 = vector.broadcast %cst_67 : f32 to vector<17x128xf32>
    %137 = arith.mulf %136, %135 : vector<17x128xf32>
    %cst_68 = arith.constant 0.707106769 : f32
    %138 = vector.broadcast %cst_68 : f32 to vector<17x128xf32>
    %139 = arith.mulf %135, %138 : vector<17x128xf32>
    %140 = math.erf %139 : vector<17x128xf32>
    %cst_69 = arith.constant 1.000000e+00 : f32
    %141 = vector.broadcast %cst_69 : f32 to vector<17x128xf32>
    %142 = arith.addf %141, %140 : vector<17x128xf32>
    %143 = arith.mulf %137, %142 : vector<17x128xf32>
    %c0_70 = arith.constant 0 : index
    %c0_71 = arith.constant 0 : index
    %c0_72 = arith.constant 0 : index
    %144 = vector.load %arg15[%c0_70, %c0_71, %c0_72] : memref<2x128x32xbf16, #tpu.memory_space<vmem>>, vector<1x128x32xbf16>
    %145 = vector.shape_cast %144 : vector<1x128x32xbf16> to vector<128x32xbf16>
    %c0_73 = arith.constant 0 : index
    %c0_74 = arith.constant 0 : index
    %c0_75 = arith.constant 0 : index
    %146 = vector.load %arg16[%c0_73, %c0_74, %c0_75] : memref<2x1x32xf32, #tpu.memory_space<vmem>>, vector<1x1x32xf32>
    %147 = vector.shape_cast %146 : vector<1x1x32xf32> to vector<1x32xf32>
    %148 = arith.truncf %143 : vector<17x128xf32> to vector<17x128xbf16>
    %cst_76 = arith.constant dense<0.000000e+00> : vector<17x32xf32>
    %149 = tpu.matmul %148, %145, %cst_76 {dimension_numbers = #tpu.dot_dimension_numbers<[1], [0], [0], [1], [0, 0, 1, 1], [], []>} : vector<17x128xbf16>, vector<128x32xbf16>, vector<17x32xf32> -> vector<17x32xf32>
    %150 = vector.broadcast %147 : vector<1x32xf32> to vector<17x32xf32>
    %151 = arith.addf %149, %150 : vector<17x32xf32>
    %152 = arith.addf %101, %151 : vector<17x32xf32>
    %c1_77 = arith.constant 1 : index
    %c0_78 = arith.constant 0 : index
    %c0_79 = arith.constant 0 : index
    %153 = vector.load %arg4[%c1_77, %c0_78, %c0_79] : memref<2x1x32xf32, #tpu.memory_space<vmem>>, vector<1x1x32xf32>
    %154 = vector.shape_cast %153 : vector<1x1x32xf32> to vector<1x32xf32>
    %c1_80 = arith.constant 1 : index
    %c0_81 = arith.constant 0 : index
    %c0_82 = arith.constant 0 : index
    %155 = vector.load %arg5[%c1_80, %c0_81, %c0_82] : memref<2x1x32xf32, #tpu.memory_space<vmem>>, vector<1x1x32xf32>
    %156 = vector.shape_cast %155 : vector<1x1x32xf32> to vector<1x32xf32>
    %cst_83 = arith.constant dense<0.000000e+00> : vector<17xf32>
    %157 = vector.multi_reduction <add>, %152, %cst_83 [1] : vector<17x32xf32> to vector<17xf32>
    %158 = vector.shape_cast %157 : vector<17xf32> to vector<17x1xf32>
    %cst_84 = arith.constant 3.200000e+01 : f32
    %159 = vector.broadcast %cst_84 : f32 to vector<17x1xf32>
    %160 = arith.divf %158, %159 : vector<17x1xf32>
    %161 = vector.broadcast %160 : vector<17x1xf32> to vector<17x32xf32>
    %162 = arith.subf %152, %161 : vector<17x32xf32>
    %163 = arith.mulf %162, %162 : vector<17x32xf32>
    %cst_85 = arith.constant dense<0.000000e+00> : vector<17xf32>
    %164 = vector.multi_reduction <add>, %163, %cst_85 [1] : vector<17x32xf32> to vector<17xf32>
    %165 = vector.shape_cast %164 : vector<17xf32> to vector<17x1xf32>
    %cst_86 = arith.constant 3.200000e+01 : f32
    %166 = vector.broadcast %cst_86 : f32 to vector<17x1xf32>
    %167 = arith.divf %165, %166 : vector<17x1xf32>
    %168 = vector.broadcast %160 : vector<17x1xf32> to vector<17x32xf32>
    %169 = arith.subf %152, %168 : vector<17x32xf32>
    %cst_87 = arith.constant 9.99999996E-13 : f32
    %170 = vector.broadcast %cst_87 : f32 to vector<17x1xf32>
    %171 = arith.addf %167, %170 : vector<17x1xf32>
    %172 = math.rsqrt %171 : vector<17x1xf32>
    %173 = vector.broadcast %172 : vector<17x1xf32> to vector<17x32xf32>
    %174 = arith.mulf %169, %173 : vector<17x32xf32>
    %175 = vector.broadcast %154 : vector<1x32xf32> to vector<17x32xf32>
    %176 = arith.mulf %174, %175 : vector<17x32xf32>
    %177 = vector.broadcast %156 : vector<1x32xf32> to vector<17x32xf32>
    %178 = arith.addf %176, %177 : vector<17x32xf32>
    %c1_88 = arith.constant 1 : index
    %c0_89 = arith.constant 0 : index
    %c0_90 = arith.constant 0 : index
    %179 = vector.load %arg6[%c1_88, %c0_89, %c0_90] : memref<2x32x96xbf16, #tpu.memory_space<vmem>>, vector<1x32x96xbf16>
    %180 = vector.shape_cast %179 : vector<1x32x96xbf16> to vector<32x96xbf16>
    %c1_91 = arith.constant 1 : index
    %c0_92 = arith.constant 0 : index
    %c0_93 = arith.constant 0 : index
    %181 = vector.load %arg7[%c1_91, %c0_92, %c0_93] : memref<2x1x96xf32, #tpu.memory_space<vmem>>, vector<1x1x96xf32>
    %182 = vector.shape_cast %181 : vector<1x1x96xf32> to vector<1x96xf32>
    %183 = arith.truncf %178 : vector<17x32xf32> to vector<17x32xbf16>
    %cst_94 = arith.constant dense<0.000000e+00> : vector<17x96xf32>
    %184 = tpu.matmul %183, %180, %cst_94 {dimension_numbers = #tpu.dot_dimension_numbers<[1], [0], [0], [1], [0, 0, 1, 1], [], []>} : vector<17x32xbf16>, vector<32x96xbf16>, vector<17x96xf32> -> vector<17x96xf32>
    %185 = vector.broadcast %182 : vector<1x96xf32> to vector<17x96xf32>
    %186 = arith.addf %184, %185 : vector<17x96xf32>
    %c1_95 = arith.constant 1 : index
    %c0_96 = arith.constant 0 : index
    %c0_97 = arith.constant 0 : index
    %187 = vector.load %arg8[%c1_95, %c0_96, %c0_97] : memref<2x32x32xbf16, #tpu.memory_space<vmem>>, vector<1x32x32xbf16>
    %188 = vector.shape_cast %187 : vector<1x32x32xbf16> to vector<32x32xbf16>
    %c1_98 = arith.constant 1 : index
    %c0_99 = arith.constant 0 : index
    %c0_100 = arith.constant 0 : index
    %189 = vector.load %arg9[%c1_98, %c0_99, %c0_100] : memref<2x1x32xf32, #tpu.memory_space<vmem>>, vector<1x1x32xf32>
    %190 = vector.shape_cast %189 : vector<1x1x32xf32> to vector<1x32xf32>
    %191 = vector.extract_strided_slice %186 {offsets = [0, 0], sizes = [17, 16], strides = [1, 1]} : vector<17x96xf32> to vector<17x16xf32>
    %192 = vector.extract_strided_slice %186 {offsets = [0, 32], sizes = [17, 16], strides = [1, 1]} : vector<17x96xf32> to vector<17x16xf32>
    %193 = vector.extract_strided_slice %186 {offsets = [0, 64], sizes = [17, 16], strides = [1, 1]} : vector<17x96xf32> to vector<17x16xf32>
    %194 = arith.truncf %191 : vector<17x16xf32> to vector<17x16xbf16>
    %195 = arith.truncf %192 : vector<17x16xf32> to vector<17x16xbf16>
    %cst_101 = arith.constant dense<0.000000e+00> : vector<17x17xf32>
    %196 = tpu.matmul %194, %195, %cst_101 {dimension_numbers = #tpu.dot_dimension_numbers<[1], [1], [0], [0], [0, 0, 1, 0], [], []>} : vector<17x16xbf16>, vector<17x16xbf16>, vector<17x17xf32> -> vector<17x17xf32>
    %cst_102 = arith.constant 2.500000e-01 : f32
    %197 = vector.broadcast %cst_102 : f32 to vector<17x17xf32>
    %198 = arith.mulf %196, %197 : vector<17x17xf32>
    %c1_103 = arith.constant 1 : index
    %c0_104 = arith.constant 0 : index
    %c0_105 = arith.constant 0 : index
    %c0_106 = arith.constant 0 : index
    %199 = vector.load %arg10[%c1_103, %c0_104, %c0_105, %c0_106] : memref<2x2x17x17xf32, #tpu.memory_space<vmem>>, vector<1x1x17x17xf32>
    %200 = vector.shape_cast %199 : vector<1x1x17x17xf32> to vector<17x17xf32>
    %201 = arith.addf %198, %200 : vector<17x17xf32>
    %cst_107 = arith.constant dense<0xFF800000> : vector<17xf32>
    %202 = vector.multi_reduction <maximumf>, %201, %cst_107 [1] : vector<17x17xf32> to vector<17xf32>
    %203 = vector.shape_cast %202 : vector<17xf32> to vector<17x1xf32>
    %204 = vector.broadcast %203 : vector<17x1xf32> to vector<17x17xf32>
    %205 = arith.subf %201, %204 : vector<17x17xf32>
    %206 = math.exp %205 : vector<17x17xf32>
    %cst_108 = arith.constant dense<0.000000e+00> : vector<17xf32>
    %207 = vector.multi_reduction <add>, %206, %cst_108 [1] : vector<17x17xf32> to vector<17xf32>
    %208 = vector.shape_cast %207 : vector<17xf32> to vector<17x1xf32>
    %209 = tpu.reciprocal %208 {approx = true} : vector<17x1xf32> -> vector<17x1xf32>
    %210 = arith.truncf %206 : vector<17x17xf32> to vector<17x17xbf16>
    %211 = arith.truncf %193 : vector<17x16xf32> to vector<17x16xbf16>
    %cst_109 = arith.constant dense<0.000000e+00> : vector<17x16xf32>
    %212 = tpu.matmul %210, %211, %cst_109 {dimension_numbers = #tpu.dot_dimension_numbers<[1], [0], [0], [1], [0, 0, 1, 1], [], []>} : vector<17x17xbf16>, vector<17x16xbf16>, vector<17x16xf32> -> vector<17x16xf32>
    %213 = vector.broadcast %209 : vector<17x1xf32> to vector<17x16xf32>
    %214 = arith.mulf %212, %213 : vector<17x16xf32>
    %215 = arith.truncf %214 : vector<17x16xf32> to vector<17x16xbf16>
    %216 = vector.extract_strided_slice %188 {offsets = [0, 0], sizes = [16, 32], strides = [1, 1]} : vector<32x32xbf16> to vector<16x32xbf16>
    %cst_110 = arith.constant dense<0.000000e+00> : vector<17x32xf32>
    %217 = tpu.matmul %215, %216, %cst_110 {dimension_numbers = #tpu.dot_dimension_numbers<[1], [0], [0], [1], [0, 0, 1, 1], [], []>} : vector<17x16xbf16>, vector<16x32xbf16>, vector<17x32xf32> -> vector<17x32xf32>
    %218 = vector.broadcast %190 : vector<1x32xf32> to vector<17x32xf32>
    %219 = arith.addf %218, %217 : vector<17x32xf32>
    %220 = vector.extract_strided_slice %186 {offsets = [0, 16], sizes = [17, 16], strides = [1, 1]} : vector<17x96xf32> to vector<17x16xf32>
    %221 = vector.extract_strided_slice %186 {offsets = [0, 48], sizes = [17, 16], strides = [1, 1]} : vector<17x96xf32> to vector<17x16xf32>
    %222 = vector.extract_strided_slice %186 {offsets = [0, 80], sizes = [17, 16], strides = [1, 1]} : vector<17x96xf32> to vector<17x16xf32>
    %223 = arith.truncf %220 : vector<17x16xf32> to vector<17x16xbf16>
    %224 = arith.truncf %221 : vector<17x16xf32> to vector<17x16xbf16>
    %cst_111 = arith.constant dense<0.000000e+00> : vector<17x17xf32>
    %225 = tpu.matmul %223, %224, %cst_111 {dimension_numbers = #tpu.dot_dimension_numbers<[1], [1], [0], [0], [0, 0, 1, 0], [], []>} : vector<17x16xbf16>, vector<17x16xbf16>, vector<17x17xf32> -> vector<17x17xf32>
    %cst_112 = arith.constant 2.500000e-01 : f32
    %226 = vector.broadcast %cst_112 : f32 to vector<17x17xf32>
    %227 = arith.mulf %225, %226 : vector<17x17xf32>
    %c1_113 = arith.constant 1 : index
    %c1_114 = arith.constant 1 : index
    %c0_115 = arith.constant 0 : index
    %c0_116 = arith.constant 0 : index
    %228 = vector.load %arg10[%c1_113, %c1_114, %c0_115, %c0_116] : memref<2x2x17x17xf32, #tpu.memory_space<vmem>>, vector<1x1x17x17xf32>
    %229 = vector.shape_cast %228 : vector<1x1x17x17xf32> to vector<17x17xf32>
    %230 = arith.addf %227, %229 : vector<17x17xf32>
    %cst_117 = arith.constant dense<0xFF800000> : vector<17xf32>
    %231 = vector.multi_reduction <maximumf>, %230, %cst_117 [1] : vector<17x17xf32> to vector<17xf32>
    %232 = vector.shape_cast %231 : vector<17xf32> to vector<17x1xf32>
    %233 = vector.broadcast %232 : vector<17x1xf32> to vector<17x17xf32>
    %234 = arith.subf %230, %233 : vector<17x17xf32>
    %235 = math.exp %234 : vector<17x17xf32>
    %cst_118 = arith.constant dense<0.000000e+00> : vector<17xf32>
    %236 = vector.multi_reduction <add>, %235, %cst_118 [1] : vector<17x17xf32> to vector<17xf32>
    %237 = vector.shape_cast %236 : vector<17xf32> to vector<17x1xf32>
    %238 = tpu.reciprocal %237 {approx = true} : vector<17x1xf32> -> vector<17x1xf32>
    %239 = arith.truncf %235 : vector<17x17xf32> to vector<17x17xbf16>
    %240 = arith.truncf %222 : vector<17x16xf32> to vector<17x16xbf16>
    %cst_119 = arith.constant dense<0.000000e+00> : vector<17x16xf32>
    %241 = tpu.matmul %239, %240, %cst_119 {dimension_numbers = #tpu.dot_dimension_numbers<[1], [0], [0], [1], [0, 0, 1, 1], [], []>} : vector<17x17xbf16>, vector<17x16xbf16>, vector<17x16xf32> -> vector<17x16xf32>
    %242 = vector.broadcast %238 : vector<17x1xf32> to vector<17x16xf32>
    %243 = arith.mulf %241, %242 : vector<17x16xf32>
    %244 = arith.truncf %243 : vector<17x16xf32> to vector<17x16xbf16>
    %245 = vector.extract_strided_slice %188 {offsets = [16, 0], sizes = [16, 32], strides = [1, 1]} : vector<32x32xbf16> to vector<16x32xbf16>
    %cst_120 = arith.constant dense<0.000000e+00> : vector<17x32xf32>
    %246 = tpu.matmul %244, %245, %cst_120 {dimension_numbers = #tpu.dot_dimension_numbers<[1], [0], [0], [1], [0, 0, 1, 1], [], []>} : vector<17x16xbf16>, vector<16x32xbf16>, vector<17x32xf32> -> vector<17x32xf32>
    %247 = arith.addf %219, %246 : vector<17x32xf32>
    %248 = arith.addf %152, %247 : vector<17x32xf32>
    %c1_121 = arith.constant 1 : index
    %c0_122 = arith.constant 0 : index
    %c0_123 = arith.constant 0 : index
    %249 = vector.load %arg11[%c1_121, %c0_122, %c0_123] : memref<2x1x32xf32, #tpu.memory_space<vmem>>, vector<1x1x32xf32>
    %250 = vector.shape_cast %249 : vector<1x1x32xf32> to vector<1x32xf32>
    %c1_124 = arith.constant 1 : index
    %c0_125 = arith.constant 0 : index
    %c0_126 = arith.constant 0 : index
    %251 = vector.load %arg12[%c1_124, %c0_125, %c0_126] : memref<2x1x32xf32, #tpu.memory_space<vmem>>, vector<1x1x32xf32>
    %252 = vector.shape_cast %251 : vector<1x1x32xf32> to vector<1x32xf32>
    %cst_127 = arith.constant dense<0.000000e+00> : vector<17xf32>
    %253 = vector.multi_reduction <add>, %248, %cst_127 [1] : vector<17x32xf32> to vector<17xf32>
    %254 = vector.shape_cast %253 : vector<17xf32> to vector<17x1xf32>
    %cst_128 = arith.constant 3.200000e+01 : f32
    %255 = vector.broadcast %cst_128 : f32 to vector<17x1xf32>
    %256 = arith.divf %254, %255 : vector<17x1xf32>
    %257 = vector.broadcast %256 : vector<17x1xf32> to vector<17x32xf32>
    %258 = arith.subf %248, %257 : vector<17x32xf32>
    %259 = arith.mulf %258, %258 : vector<17x32xf32>
    %cst_129 = arith.constant dense<0.000000e+00> : vector<17xf32>
    %260 = vector.multi_reduction <add>, %259, %cst_129 [1] : vector<17x32xf32> to vector<17xf32>
    %261 = vector.shape_cast %260 : vector<17xf32> to vector<17x1xf32>
    %cst_130 = arith.constant 3.200000e+01 : f32
    %262 = vector.broadcast %cst_130 : f32 to vector<17x1xf32>
    %263 = arith.divf %261, %262 : vector<17x1xf32>
    %264 = vector.broadcast %256 : vector<17x1xf32> to vector<17x32xf32>
    %265 = arith.subf %248, %264 : vector<17x32xf32>
    %cst_131 = arith.constant 9.99999996E-13 : f32
    %266 = vector.broadcast %cst_131 : f32 to vector<17x1xf32>
    %267 = arith.addf %263, %266 : vector<17x1xf32>
    %268 = math.rsqrt %267 : vector<17x1xf32>
    %269 = vector.broadcast %268 : vector<17x1xf32> to vector<17x32xf32>
    %270 = arith.mulf %265, %269 : vector<17x32xf32>
    %271 = vector.broadcast %250 : vector<1x32xf32> to vector<17x32xf32>
    %272 = arith.mulf %270, %271 : vector<17x32xf32>
    %273 = vector.broadcast %252 : vector<1x32xf32> to vector<17x32xf32>
    %274 = arith.addf %272, %273 : vector<17x32xf32>
    %c1_132 = arith.constant 1 : index
    %c0_133 = arith.constant 0 : index
    %c0_134 = arith.constant 0 : index
    %275 = vector.load %arg13[%c1_132, %c0_133, %c0_134] : memref<2x32x128xbf16, #tpu.memory_space<vmem>>, vector<1x32x128xbf16>
    %276 = vector.shape_cast %275 : vector<1x32x128xbf16> to vector<32x128xbf16>
    %c1_135 = arith.constant 1 : index
    %c0_136 = arith.constant 0 : index
    %c0_137 = arith.constant 0 : index
    %277 = vector.load %arg14[%c1_135, %c0_136, %c0_137] : memref<2x1x128xf32, #tpu.memory_space<vmem>>, vector<1x1x128xf32>
    %278 = vector.shape_cast %277 : vector<1x1x128xf32> to vector<1x128xf32>
    %279 = arith.truncf %274 : vector<17x32xf32> to vector<17x32xbf16>
    %cst_138 = arith.constant dense<0.000000e+00> : vector<17x128xf32>
    %280 = tpu.matmul %279, %276, %cst_138 {dimension_numbers = #tpu.dot_dimension_numbers<[1], [0], [0], [1], [0, 0, 1, 1], [], []>} : vector<17x32xbf16>, vector<32x128xbf16>, vector<17x128xf32> -> vector<17x128xf32>
    %281 = vector.broadcast %278 : vector<1x128xf32> to vector<17x128xf32>
    %282 = arith.addf %280, %281 : vector<17x128xf32>
    %cst_139 = arith.constant 5.000000e-01 : f32
    %283 = vector.broadcast %cst_139 : f32 to vector<17x128xf32>
    %284 = arith.mulf %283, %282 : vector<17x128xf32>
    %cst_140 = arith.constant 0.707106769 : f32
    %285 = vector.broadcast %cst_140 : f32 to vector<17x128xf32>
    %286 = arith.mulf %282, %285 : vector<17x128xf32>
    %287 = math.erf %286 : vector<17x128xf32>
    %cst_141 = arith.constant 1.000000e+00 : f32
    %288 = vector.broadcast %cst_141 : f32 to vector<17x128xf32>
    %289 = arith.addf %288, %287 : vector<17x128xf32>
    %290 = arith.mulf %284, %289 : vector<17x128xf32>
    %c1_142 = arith.constant 1 : index
    %c0_143 = arith.constant 0 : index
    %c0_144 = arith.constant 0 : index
    %291 = vector.load %arg15[%c1_142, %c0_143, %c0_144] : memref<2x128x32xbf16, #tpu.memory_space<vmem>>, vector<1x128x32xbf16>
    %292 = vector.shape_cast %291 : vector<1x128x32xbf16> to vector<128x32xbf16>
    %c1_145 = arith.constant 1 : index
    %c0_146 = arith.constant 0 : index
    %c0_147 = arith.constant 0 : index
    %293 = vector.load %arg16[%c1_145, %c0_146, %c0_147] : memref<2x1x32xf32, #tpu.memory_space<vmem>>, vector<1x1x32xf32>
    %294 = vector.shape_cast %293 : vector<1x1x32xf32> to vector<1x32xf32>
    %295 = arith.truncf %290 : vector<17x128xf32> to vector<17x128xbf16>
    %cst_148 = arith.constant dense<0.000000e+00> : vector<17x32xf32>
    %296 = tpu.matmul %295, %292, %cst_148 {dimension_numbers = #tpu.dot_dimension_numbers<[1], [0], [0], [1], [0, 0, 1, 1], [], []>} : vector<17x128xbf16>, vector<128x32xbf16>, vector<17x32xf32> -> vector<17x32xf32>
    %297 = vector.broadcast %294 : vector<1x32xf32> to vector<17x32xf32>
    %298 = arith.addf %296, %297 : vector<17x32xf32>
    %299 = arith.addf %248, %298 : vector<17x32xf32>
    %c0_149 = arith.constant 0 : index
    %c0_150 = arith.constant 0 : index
    %300 = vector.load %arg17[%c0_149, %c0_150] : memref<1x32xf32, #tpu.memory_space<vmem>>, vector<1x32xf32>
    %c0_151 = arith.constant 0 : index
    %c0_152 = arith.constant 0 : index
    %301 = vector.load %arg18[%c0_151, %c0_152] : memref<1x32xf32, #tpu.memory_space<vmem>>, vector<1x32xf32>
    %cst_153 = arith.constant dense<0.000000e+00> : vector<17xf32>
    %302 = vector.multi_reduction <add>, %299, %cst_153 [1] : vector<17x32xf32> to vector<17xf32>
    %303 = vector.shape_cast %302 : vector<17xf32> to vector<17x1xf32>
    %cst_154 = arith.constant 3.200000e+01 : f32
    %304 = vector.broadcast %cst_154 : f32 to vector<17x1xf32>
    %305 = arith.divf %303, %304 : vector<17x1xf32>
    %306 = vector.broadcast %305 : vector<17x1xf32> to vector<17x32xf32>
    %307 = arith.subf %299, %306 : vector<17x32xf32>
    %308 = arith.mulf %307, %307 : vector<17x32xf32>
    %cst_155 = arith.constant dense<0.000000e+00> : vector<17xf32>
    %309 = vector.multi_reduction <add>, %308, %cst_155 [1] : vector<17x32xf32> to vector<17xf32>
    %310 = vector.shape_cast %309 : vector<17xf32> to vector<17x1xf32>
    %cst_156 = arith.constant 3.200000e+01 : f32
    %311 = vector.broadcast %cst_156 : f32 to vector<17x1xf32>
    %312 = arith.divf %310, %311 : vector<17x1xf32>
    %313 = vector.broadcast %305 : vector<17x1xf32> to vector<17x32xf32>
    %314 = arith.subf %299, %313 : vector<17x32xf32>
    %cst_157 = arith.constant 9.99999996E-13 : f32
    %315 = vector.broadcast %cst_157 : f32 to vector<17x1xf32>
    %316 = arith.addf %312, %315 : vector<17x1xf32>
    %317 = math.rsqrt %316 : vector<17x1xf32>
    %318 = vector.broadcast %317 : vector<17x1xf32> to vector<17x32xf32>
    %319 = arith.mulf %314, %318 : vector<17x32xf32>
    %320 = vector.broadcast %300 : vector<1x32xf32> to vector<17x32xf32>
    %321 = arith.mulf %319, %320 : vector<17x32xf32>
    %322 = vector.broadcast %301 : vector<1x32xf32> to vector<17x32xf32>
    %323 = arith.addf %321, %322 : vector<17x32xf32>
    %c0_158 = arith.constant 0 : index
    %c0_159 = arith.constant 0 : index
    %324 = vector.load %arg19[%c0_158, %c0_159] : memref<32x64xbf16, #tpu.memory_space<vmem>>, vector<32x64xbf16>
    %c0_160 = arith.constant 0 : index
    %c0_161 = arith.constant 0 : index
    %325 = vector.load %arg20[%c0_160, %c0_161] : memref<1x64xf32, #tpu.memory_space<vmem>>, vector<1x64xf32>
    %326 = arith.truncf %323 : vector<17x32xf32> to vector<17x32xbf16>
    %cst_162 = arith.constant dense<0.000000e+00> : vector<17x64xf32>
    %327 = tpu.matmul %326, %324, %cst_162 {dimension_numbers = #tpu.dot_dimension_numbers<[1], [0], [0], [1], [0, 0, 1, 1], [], []>} : vector<17x32xbf16>, vector<32x64xbf16>, vector<17x64xf32> -> vector<17x64xf32>
    %328 = vector.broadcast %325 : vector<1x64xf32> to vector<17x64xf32>
    %329 = arith.addf %327, %328 : vector<17x64xf32>
    %cst_163 = arith.constant 0.000000e+00 : f32
    %330 = vector.broadcast %cst_163 : f32 to vector<17x64xf32>
    %331 = arith.maximumf %329, %330 : vector<17x64xf32>
    %c0_164 = arith.constant 0 : index
    %c0_165 = arith.constant 0 : index
    %332 = vector.load %arg21[%c0_164, %c0_165] : memref<64x128xbf16, #tpu.memory_space<vmem>>, vector<64x128xbf16>
    %c0_166 = arith.constant 0 : index
    %c0_167 = arith.constant 0 : index
    %333 = vector.load %arg22[%c0_166, %c0_167] : memref<1x128xf32, #tpu.memory_space<vmem>>, vector<1x128xf32>
    %334 = arith.truncf %331 : vector<17x64xf32> to vector<17x64xbf16>
    %cst_168 = arith.constant dense<0.000000e+00> : vector<17x128xf32>
    %335 = tpu.matmul %334, %332, %cst_168 {dimension_numbers = #tpu.dot_dimension_numbers<[1], [0], [0], [1], [0, 0, 1, 1], [], []>} : vector<17x64xbf16>, vector<64x128xbf16>, vector<17x128xf32> -> vector<17x128xf32>
    %336 = vector.broadcast %333 : vector<1x128xf32> to vector<17x128xf32>
    %337 = arith.addf %335, %336 : vector<17x128xf32>
    %c0_169 = arith.constant 0 : index
    %c0_170 = arith.constant 0 : index
    %c0_171 = arith.constant 0 : index
    %338 = vector.load %arg23[%c0_169, %c0_170, %c0_171] : memref<1x17x128xf32, #tpu.memory_space<vmem>>, vector<1x17x128xf32>
    %339 = vector.shape_cast %338 : vector<1x17x128xf32> to vector<17x128xf32>
    %340 = vector.shape_cast %337 : vector<17x128xf32> to vector<1x17x128xf32>
    tpu.vector_store %arg23[%c0_169, %c0_170, %c0_171], %340 {strides = array<i32>} : memref<1x17x128xf32, #tpu.memory_space<vmem>>, vector<1x17x128xf32>,
    return
  }
  func.func @transform_0(%arg0: i32) -> (i32, i32, i32) {
    %c0_i32 = arith.constant 0 : i32
    %c0_i32_0 = arith.constant 0 : i32
    %c0_i32_1 = arith.constant 0 : i32
    return %arg0, %c0_i32, %c0_i32_0 : i32, i32, i32
  }
  func.func @transform_1(%arg0: i32) -> (i32, i32) {
    %c0_i32 = arith.constant 0 : i32
    %c0_i32_0 = arith.constant 0 : i32
    %c0_i32_1 = arith.constant 0 : i32
    return %c0_i32, %c0_i32_0 : i32, i32
  }
  func.func @transform_2(%arg0: i32) -> (i32, i32) {
    %c0_i32 = arith.constant 0 : i32
    %c0_i32_0 = arith.constant 0 : i32
    %c0_i32_1 = arith.constant 0 : i32
    return %c0_i32, %c0_i32_0 : i32, i32
  }
  func.func @transform_3(%arg0: i32) -> (i32, i32, i32) {
    %c0_i32 = arith.constant 0 : i32
    %c0_i32_0 = arith.constant 0 : i32
    %c0_i32_1 = arith.constant 0 : i32
    %c0_i32_2 = arith.constant 0 : i32
    return %c0_i32, %c0_i32_0, %c0_i32_1 : i32, i32, i32
  }
  func.func @transform_4(%arg0: i32) -> (i32, i32, i32) {
    %c0_i32 = arith.constant 0 : i32
    %c0_i32_0 = arith.constant 0 : i32
    %c0_i32_1 = arith.constant 0 : i32
    %c0_i32_2 = arith.constant 0 : i32
    return %c0_i32, %c0_i32_0, %c0_i32_1 : i32, i32, i32
  }
  func.func @transform_5(%arg0: i32) -> (i32, i32, i32) {
    %c0_i32 = arith.constant 0 : i32
    %c0_i32_0 = arith.constant 0 : i32
    %c0_i32_1 = arith.constant 0 : i32
    %c0_i32_2 = arith.constant 0 : i32
    return %c0_i32, %c0_i32_0, %c0_i32_1 : i32, i32, i32
  }
  func.func @transform_6(%arg0: i32) -> (i32, i32, i32) {
    %c0_i32 = arith.constant 0 : i32
    %c0_i32_0 = arith.constant 0 : i32
    %c0_i32_1 = arith.constant 0 : i32
    %c0_i32_2 = arith.constant 0 : i32
    return %c0_i32, %c0_i32_0, %c0_i32_1 : i32, i32, i32
  }
  func.func @transform_7(%arg0: i32) -> (i32, i32, i32) {
    %c0_i32 = arith.constant 0 : i32
    %c0_i32_0 = arith.constant 0 : i32
    %c0_i32_1 = arith.constant 0 : i32
    %c0_i32_2 = arith.constant 0 : i32
    return %c0_i32, %c0_i32_0, %c0_i32_1 : i32, i32, i32
  }
  func.func @transform_8(%arg0: i32) -> (i32, i32, i32) {
    %c0_i32 = arith.constant 0 : i32
    %c0_i32_0 = arith.constant 0 : i32
    %c0_i32_1 = arith.constant 0 : i32
    %c0_i32_2 = arith.constant 0 : i32
    return %c0_i32, %c0_i32_0, %c0_i32_1 : i32, i32, i32
  }
  func.func @transform_9(%arg0: i32) -> (i32, i32, i32, i32) {
    %c0_i32 = arith.constant 0 : i32
    %c0_i32_0 = arith.constant 0 : i32
    %c0_i32_1 = arith.constant 0 : i32
    %c0_i32_2 = arith.constant 0 : i32
    %c0_i32_3 = arith.constant 0 : i32
    return %c0_i32, %c0_i32_0, %c0_i32_1, %c0_i32_2 : i32, i32, i32, i32
  }
  func.func @transform_10(%arg0: i32) -> (i32, i32, i32) {
    %c0_i32 = arith.constant 0 : i32
    %c0_i32_0 = arith.constant 0 : i32
    %c0_i32_1 = arith.constant 0 : i32
    %c0_i32_2 = arith.constant 0 : i32
    return %c0_i32, %c0_i32_0, %c0_i32_1 : i32, i32, i32
  }
  func.func @transform_11(%arg0: i32) -> (i32, i32, i32) {
    %c0_i32 = arith.constant 0 : i32
    %c0_i32_0 = arith.constant 0 : i32
    %c0_i32_1 = arith.constant 0 : i32
    %c0_i32_2 = arith.constant 0 : i32
    return %c0_i32, %c0_i32_0, %c0_i32_1 : i32, i32, i32
  }
  func.func @transform_12(%arg0: i32) -> (i32, i32, i32) {
    %c0_i32 = arith.constant 0 : i32
    %c0_i32_0 = arith.constant 0 : i32
    %c0_i32_1 = arith.constant 0 : i32
    %c0_i32_2 = arith.constant 0 : i32
    return %c0_i32, %c0_i32_0, %c0_i32_1 : i32, i32, i32
  }
  func.func @transform_13(%arg0: i32) -> (i32, i32, i32) {
    %c0_i32 = arith.constant 0 : i32
    %c0_i32_0 = arith.constant 0 : i32
    %c0_i32_1 = arith.constant 0 : i32
    %c0_i32_2 = arith.constant 0 : i32
    return %c0_i32, %c0_i32_0, %c0_i32_1 : i32, i32, i32
  }
  func.func @transform_14(%arg0: i32) -> (i32, i32, i32) {
    %c0_i32 = arith.constant 0 : i32
    %c0_i32_0 = arith.constant 0 : i32
    %c0_i32_1 = arith.constant 0 : i32
    %c0_i32_2 = arith.constant 0 : i32
    return %c0_i32, %c0_i32_0, %c0_i32_1 : i32, i32, i32
  }
  func.func @transform_15(%arg0: i32) -> (i32, i32, i32) {
    %c0_i32 = arith.constant 0 : i32
    %c0_i32_0 = arith.constant 0 : i32
    %c0_i32_1 = arith.constant 0 : i32
    %c0_i32_2 = arith.constant 0 : i32
    return %c0_i32, %c0_i32_0, %c0_i32_1 : i32, i32, i32
  }
  func.func @transform_16(%arg0: i32) -> (i32, i32) {
    %c0_i32 = arith.constant 0 : i32
    %c0_i32_0 = arith.constant 0 : i32
    %c0_i32_1 = arith.constant 0 : i32
    return %c0_i32, %c0_i32_0 : i32, i32
  }
  func.func @transform_17(%arg0: i32) -> (i32, i32) {
    %c0_i32 = arith.constant 0 : i32
    %c0_i32_0 = arith.constant 0 : i32
    %c0_i32_1 = arith.constant 0 : i32
    return %c0_i32, %c0_i32_0 : i32, i32
  }
  func.func @transform_18(%arg0: i32) -> (i32, i32) {
    %c0_i32 = arith.constant 0 : i32
    %c0_i32_0 = arith.constant 0 : i32
    %c0_i32_1 = arith.constant 0 : i32
    return %c0_i32, %c0_i32_0 : i32, i32
  }
  func.func @transform_19(%arg0: i32) -> (i32, i32) {
    %c0_i32 = arith.constant 0 : i32
    %c0_i32_0 = arith.constant 0 : i32
    %c0_i32_1 = arith.constant 0 : i32
    return %c0_i32, %c0_i32_0 : i32, i32
  }
  func.func @transform_20(%arg0: i32) -> (i32, i32) {
    %c0_i32 = arith.constant 0 : i32
    %c0_i32_0 = arith.constant 0 : i32
    %c0_i32_1 = arith.constant 0 : i32
    return %c0_i32, %c0_i32_0 : i32, i32
  }
  func.func @transform_21(%arg0: i32) -> (i32, i32) {
    %c0_i32 = arith.constant 0 : i32
    %c0_i32_0 = arith.constant 0 : i32
    %c0_i32_1 = arith.constant 0 : i32
    return %c0_i32, %c0_i32_0 : i32, i32
  }
  func.func @transform_22(%arg0: i32) -> (i32, i32, i32) {
    %c0_i32 = arith.constant 0 : i32
    %c0_i32_0 = arith.constant 0 : i32
    %c0_i32_1 = arith.constant 0 : i32
    return %arg0, %c0_i32, %c0_i32_0 : i32, i32, i32
  }
}

</mosaic_0001>

<bundles_post_ra>
// kernel: tpu_custom_call.1
= control target key start
LH: loop header
LB: loop body
LE: loop exit
PB: predicated region body
PF: predicated region fallthrough
CT: control target
= control target key end

     0   :  { %s4229_s0 = inlined_call_operand.vmem [shape: bf16[2,17,192], index: 0, kind: input, shape index: {}]   ;;  %s4230_s1 = inlined_call_operand.vmem [shape: bf16[192,32], index: 1, kind: input, shape index: {}]   ;;  %s4231_s2 = inlined_call_operand.vmem [shape: f32[17,32], index: 2, kind: input, shape index: {}]   ;;  %s4232_s3 = inlined_call_operand.vmem [shape: f32[2,1,32], index: 3, kind: input, shape index: {}]   ;;  %s4233_s4 = inlined_call_operand.vmem [shape: f32[2,1,32], index: 4, kind: input, shape index: {}]   ;;  %s4234_s5 = inlined_call_operand.vmem [shape: bf16[2,32,96], index: 5, kind: input, shape index: {}]   ;;  %s4235_s6 = inlined_call_operand.vmem [shape: f32[2,1,96], index: 6, kind: input, shape index: {}]   ;;  %s4236_s7 = inlined_call_operand.vmem [shape: bf16[2,32,32], index: 7, kind: input, shape index: {}]   ;;  %s4237_s8 = inlined_call_operand.vmem [shape: f32[2,1,32], index: 8, kind: input, shape index: {}]   ;;  %s4238_s9 = inlined_call_operand.vmem [shape: f32[2,2,17,17], index: 9, kind: input, shape index: {}]   ;;  %s4239_s10 = inlined_call_operand.vmem [shape: f32[2,1,32], index: 10, kind: input, shape index: {}]   ;;  %s4240_s11 = inlined_call_operand.vmem [shape: f32[2,1,32], index: 11, kind: input, shape index: {}]   ;;  %s4241_s12 = inlined_call_operand.vmem [shape: bf16[2,32,128], index: 12, kind: input, shape index: {}]   ;;  %s4242_s13 = inlined_call_operand.vmem [shape: f32[2,1,128], index: 13, kind: input, shape index: {}]   ;;  %s4243_s14 = inlined_call_operand.vmem [shape: bf16[2,128,32], index: 14, kind: input, shape index: {}]   ;;  %s4244_s15 = inlined_call_operand.vmem [shape: f32[2,1,32], index: 15, kind: input, shape index: {}]   ;;  %s4245_s16 = inlined_call_operand.vmem [shape: f32[1,32], index: 16, kind: input, shape index: {}]   ;;  %s4246_s17 = inlined_call_operand.vmem [shape: f32[1,32], index: 17, kind: input, shape index: {}]   ;;  %s4247_s18 = inlined_call_operand.vmem [shape: bf16[32,64], index: 18, kind: input, shape index: {}]   ;;  %s4248_s19 = inlined_call_operand.vmem [shape: f32[1,64], index: 19, kind: input, shape index: {}]   ;;  %s4249_s20 = inlined_call_operand.vmem [shape: bf16[64,128], index: 20, kind: input, shape index: {}]   ;;  %s4250_s21 = inlined_call_operand.vmem [shape: f32[1,128], index: 21, kind: input, shape index: {}]   ;;  %s4251_s22 = inlined_call_operand.vmem [shape: f32[2,17,128], index: 22, kind: output, shape index: {}]  }
   0x1   :  { %4270 = sst [smem:[#allocation2_spill]] %s4229_s0 }
   0x2   :  { %4271 = sst [smem:[#allocation3_spill]] %s4230_s1 }
   0x3   :  { %4272 = sst [smem:[#allocation4_spill]] %s4231_s2 }
   0x4   :  { %4273 = sst [smem:[#allocation5_spill]] %s4232_s3  ;;  %s3714_s3 = smov 0  }
   0x5   :  { %4274 = sst [smem:[#allocation6_spill]] %s4233_s4 }
   0x6   :  { %4275 = sst [smem:[#allocation7_spill]] %s4234_s5 }
   0x7   :  { %4276 = sst [smem:[#allocation8_spill]] %s4235_s6 }
   0x8 LB: > { %s2989_s28 = sadd.s32 4294967295, %s3591_s3   ;;  %p2993_p0 = scmp.ge.s32.totalorder %s3591_s3, 1  ;;  %s3591_s3 = sphi %s3714_s3, %s32_s3  }
   0x9   : > { %p612_p1 = scmp.lt.s32.totalorder %s3591_s3, 3 }
   0xb   : > { %p613_p2 = pnand %p2993_p0, %p612_p1 }
   0xc   : > { %s4277_s4 = sld [smem:[#allocation3_spill]] (!%p613_p2)  ;;  %v3593_v1 = vmov (!%p613_p2), 0   ;;  %p674_p3 = scmp.lt.s32.totalorder (!%p613_p2), %s2989_s28, 1  ;;  %vm802_vm0 = vcmask (!%p613_p2), 523264   ;;  %vm859_vm1 = vcmask (!%p613_p2), 261120   ;;  %vm866_vm2 = vcmask (!%p613_p2), 253952  }
   0xd   : > { %616 = sbr.rel (%p613_p2) target bundleno = 6577 (0x19b1), region = 108  ;;  %809 = vmatprep.subr.bf16.mxu0 (!%p613_p2), %v3593_v1  ;;  %s4278_s27 = sld [smem:[#allocation2_spill]] (!%p613_p2)  ;;  %vm1011_vm3 = vcmask (!%p613_p2), 130048   ;;  %vm1088_vm4 = vcmask (!%p613_p2), 131072   ;;  %vm1081_vm5 = vcmask (!%p613_p2), 138240   ;;  %vm1126_vm6 = vcmask (!%p613_p2), 1040384  }
   0xe   : > { %s4279_s2 = sld [smem:[#allocation4_spill]] (!%p613_p2)  ;;  %s4280_s5 = sld [smem:[#allocation7_spill]] (!%p613_p2) }
   0xf   : > { %s4281_s30 = sld [smem:[#allocation5_spill]] (!%p613_p2)  ;;  %s4282_s23 = sld [smem:[#allocation6_spill]] (!%p613_p2) }
  0x10   : > { %s4283_s25 = sld [smem:[#allocation8_spill]] (!%p613_p2)  ;;  %s4267_s26 = smov (!%p613_p2), 96  }
  0x11   : > { %s4261_s0 = smov (!%p613_p2), 80   ;;  %s4259_s1 = smov (!%p613_p2), 112  }
  0x12   : > { %v3444_v0 = vld [vmem:[%s4277_s4] sm:$0xff] (!%p613_p2)   ;;  %v3445_v2 = vld [vmem:[%s4277_s4 + $0x8] sm:$0xff] (!%p613_p2)   ;;  %v3446_v3 = vld [vmem:[%s4277_s4 + $0x10] sm:$0xff] (!%p613_p2)   ;;  %s4284_s6 = smov (!%p613_p2), 96  }
  0x13   : > { %810 = vmatpush1.bf16.msra.mxu0 (!%p613_p2), %v3444_v0  ;;  %v3447_v4 = vld [vmem:[%s4277_s4 + $0x18] sm:$0xff] (!%p613_p2)   ;;  %v3448_v5 = vld [vmem:[%s4277_s4 + $0x20] sm:$0xff] (!%p613_p2)   ;;  %v3449_v7 = vld [vmem:[%s4277_s4 + $0x28] sm:$0xff] (!%p613_p2)  }
  0x14   : > { %811 = vmatprep.subr.bf16.mxu0 %v3593_v1  ;;  %s4291_s28 = smov (!%p674_p3, %s2989_s28), 1  ;;  %v3450_v8 = vld [vmem:[%s4277_s4 + $0x30] sm:$0xff]   ;;  %v3451_v9 = vld [vmem:[%s4277_s4 + $0x38] sm:$0xff]   ;;  %v3452_v10 = vld [vmem:[%s4277_s4 + $0x40] sm:$0xff]  }
  0x15   : > { %s4258_s24 = smul.u32 24, %s4291_s28  ;;  %v3453_v11 = vld [vmem:[%s4277_s4 + $0x48] sm:$0xff]   ;;  %v3454_v12 = vld [vmem:[%s4277_s4 + $0x50] sm:$0xff]   ;;  %v3455_v13 = vld [vmem:[%s4277_s4 + $0x58] sm:$0xff]  }
  0x16   : > { %v712_v18 = vld [vmem:[%s4279_s2] sm:$0xff]  ;;  %v713_v20 = vld [vmem:[%s4279_s2 + $0x8] sm:$0xff]  ;;  %v714_v27 = vld [vmem:[%s4279_s2 + $0x10] sm:$0x1] }
  0x17   : > { %812 = vmatpush1.bf16.msra.mxu0 %v3445_v2  ;;  %s678_s29 = scalar_lea.vmem %s4278_s27, %s4258_s24  ;;  %v3461_v50 = vld [vmem:[%s4280_s5] sm:$0xff]   ;;  %v3462_v51 = vld [vmem:[%s4280_s5 + $0x8] sm:$0xff]   ;;  %s4263_s27 = smov 64  }
  0x18   : > { %813 = vmatprep.subr.bf16.mxu0 %v3593_v1  ;;  %v3458_v6 = vld [vmem:[%s678_s29 + $0x4] ss:$8 sps:$4 sm:$0xff]   ;;  %v687_v14 = vld [vmem:[%s678_s29 + $0x10] sm:$0x11]  ;;  %v3456_v15 = vld [vmem:[%s678_s29] ss:$8 sps:$4 sm:$0xff]   ;;  %3241 = vmatprep.subr.bf16.mxu1 %v3461_v50 }
  0x19   : > { %3012 = vmatprep.mubr.msk.bf16.mxu0 %vm802_vm0, %v3458_v6  ;;  %v2999_v16 = vcombine.high %v687_v14, %v687_v14  ;;  %v2998_v17 = vcombine.low %v687_v14, %v687_v14  ;;  %3242 = vmatpush3.bf16.msra.mxu1 %v3461_v50  ;;  %v3014_v63 = vld [vmem:[%s4281_s30] ss:$0 sm:$0xff]  ;;  %s4285_s24 = smov 64  }
  0x1a   : > { %3243 = vmatprep.subr.bf16.mxu1 %v3462_v51  ;;  %v3016_v14 = vld [vmem:[%s4283_s25] ss:$0 sm:$0xff] }
  0x1b   : > { %814 = vmatpush1.bf16.msra.mxu0 %v3446_v3 }
  0x1c   : > { %815 = vmatprep.subr.bf16.mxu0 %v3593_v1 }
  0x1d   : > { %3244 = vmatpush3.bf16.msra.mxu1 %v3462_v51 }
  0x1f   : > { %816 = vmatpush1.bf16.msra.mxu0 %v3447_v4  ;;  %v3015_v4 = vld [vmem:[%s4282_s23] ss:$0 sm:$0xff] }
  0x20   : > { %817 = vmatprep.subr.bf16.mxu0 %v3593_v1 }
  0x23   : > { %818 = vmatpush1.bf16.msra.mxu0 %v3448_v5 }
  0x24   : > { %819 = vmatprep.subr.bf16.mxu0 %v3593_v1 }
  0x27   : > { %820 = vmatpush1.bf16.msra.mxu0 %v3449_v7 }
  0x28   : > { %821 = vmatprep.subr.bf16.mxu0 %v3593_v1 }
  0x2b   : > { %822 = vmatpush1.bf16.msra.mxu0 %v3450_v8 }
  0x2c   : > { %823 = vmatprep.subr.bf16.mxu0 %v3593_v1 }
  0x2f   : > { %824 = vmatpush1.bf16.msra.mxu0 %v3451_v9 }
  0x30   : > { %825 = vmatprep.subr.bf16.mxu0 %v3593_v1 }
  0x33   : > { %826 = vmatpush1.bf16.msra.mxu0 %v3452_v10 }
  0x34   : > { %827 = vmatprep.subr.bf16.mxu0 %v3593_v1 }
  0x37   : > { %828 = vmatpush1.bf16.msra.mxu0 %v3453_v11 }
  0x38   : > { %829 = vmatprep.subr.bf16.mxu0 %v3593_v1 }
  0x3b   : > { %830 = vmatpush1.bf16.msra.mxu0 %v3454_v12 }
  0x3c   : > { %831 = vmatprep.subr.bf16.mxu0 %v3593_v1 }
  0x3f   : > { %832 = vmatpush1.bf16.msra.mxu0 %v3455_v13 }
  0x42   : > { %842 = vmatmul.mubr.bf16.vlgmr.msra.gmra.mrb[0].mxu0 %v3456_v15 }
  0x43   : > { %3013 = vmatprep.mubr.msk.bf16.mxu0 %vm802_vm0, %v2999_v16 }
  0x4a   : > { %850 = vmatmul.mubr.bf16.gmra.mrb[4].mxu0 %v2998_v17 }
 0x115   : > { %v843_v19 = vpop.f32.mrb[0].mxu0 }
 0x116   : > { %v3786_v21 = vadd.f32 %v843_v19, %v712_v18  ;;  %v845_v22 = vpop.f32.mrb[1].mxu0 }
 0x117   : > { %v846_v23 = vpop.f32.mrb[2].mxu0 }
 0x118   : > { %v3788_v24 = vadd.f32 %v846_v23, %v713_v20  ;;  %v848_v25 = vpop.f32.mrb[3].mxu0  ;;  %v860_v26 = vsel %vm859_vm1, %v3786_v21, 0.0 }
 0x119   : > { %861 = vadd.xlane.f32.xlu0 %v860_v26 }
 0x11a   : > { %v863_v28 = vsel %vm859_vm1, %v3788_v24, 0.0 }
 0x11d   : > { %v851_v29 = vpop.f32.mrb[4].mxu0  ;;  %864 = vadd.xlane.f32.xlu0 %v863_v28 }
 0x11e   : > { %v3797_v30 = vadd.f32 %v851_v29, %v714_v27  ;;  %v853_v31 = vpop.f32.mrb[5].mxu0 }
 0x11f   : > { %v854_v32 = vpop.f32.mrb[6].mxu0 }
 0x120   : > { %v855_v33 = vpop.f32.mrb[7].mxu0  ;;  %v867_v34 = vsel %vm866_vm2, %v3797_v30, 0.0  ;;  %v1077_v32 = vld [vmem:[%s4238_s9 + $0x10] sm:$0x1] }
 0x121   : > { %868 = vadd.xlane.f32.xlu1 %v867_v34 }
 0x1a6   : > { %v862_v35 = vpop.xlane.xlu0 %861 }
 0x1a7   : > { %v871_v36 = vmul.f32 0.03125, %v862_v35  ;;  %v1075_v35 = vld [vmem:[%s4238_s9] sm:$0xff] }
 0x1a9   : > { %v874_v37 = vsub.f32 %v3786_v21, %v871_v36 }
 0x1aa   : > { %v865_v38 = vpop.xlane.xlu0 %864 }
 0x1ab   : > { %v872_v39 = vmul.f32 0.03125, %v865_v38  ;;  %v877_v40 = vmul.f32 %v874_v37, %v874_v37 }
 0x1ad   : > { %v875_v41 = vsub.f32 %v3788_v24, %v872_v39  ;;  %v880_v42 = vsel %vm859_vm1, %v877_v40, 0.0  ;;  %v1076_v40 = vld [vmem:[%s4238_s9 + $0x8] sm:$0xff] }
 0x1ae   : > { %v869_v43 = vpop.xlane.xlu1 %868  ;;  %881 = vadd.xlane.f32.xlu1 %v880_v42 }
 0x1af   : > { %v873_v44 = vmul.f32 0.03125, %v869_v43  ;;  %v878_v45 = vmul.f32 %v875_v41, %v875_v41 }
 0x1b1   : > { %v876_v46 = vsub.f32 %v3797_v30, %v873_v44  ;;  %v883_v47 = vsel %vm859_vm1, %v878_v45, 0.0 }
 0x1b2   : > { %884 = vadd.xlane.f32.xlu0 %v883_v47 }
 0x1b3   : > { %v879_v48 = vmul.f32 %v876_v46, %v876_v46 }
 0x1b5   : > { %v886_v49 = vsel %vm866_vm2, %v879_v48, 0.0 }
 0x1b6   : > { %887 = vadd.xlane.f32.xlu1 %v886_v49 }
 0x23b   : > { %v882_v52 = vpop.xlane.xlu1 %881 }
 0x23c   : > { %v889_v53 = vmul.f32 0.03125, %v882_v52 }
 0x23e   : > { %v892_v54 = vadd.f32 1e-12, %v889_v53 }
 0x23f   : > { %v885_v55 = vpop.xlane.xlu0 %884 }
 0x240   : > { %3495 = vrsqrt.f32 %v892_v54  ;;  %v890_v56 = vmul.f32 0.03125, %v885_v55 }
 0x242   : > { %v893_v57 = vadd.f32 1e-12, %v890_v56  ;;  %v3857_v56 = vsel %vm1126_vm6, 65535, %v3593_v1 }
 0x243   : > { %v888_v58 = vpop.xlane.xlu1 %887 }
 0x244   : > { %3497 = vrsqrt.f32 %v893_v57  ;;  %v891_v59 = vmul.f32 0.03125, %v888_v58 }
 0x246   : > { %v894_v60 = vadd.f32 1e-12, %v891_v59 }
 0x248   : > { %3499 = vrsqrt.f32 %v894_v60 }
 0x24a   : > { %v3496_v61 = vpop.eup %3495 }
 0x24b   : > { %v898_v62 = vmul.f32 %v3496_v61, %v874_v37 }
 0x24d   : > { %v907_v3 = vmul.f32 %v3014_v63, %v898_v62 }
 0x24e   : > { %v3498_v0 = vpop.eup %3497 }
 0x24f   : > { %v899_v2 = vmul.f32 %v3498_v0, %v875_v41  ;;  %v916_v7 = vadd.f32 %v3015_v4, %v907_v3 }
 0x251   : > { %v908_v5 = vmul.f32 %v3014_v63, %v899_v2 }
 0x252   : > { %v3500_v6 = vpop.eup %3499 }
 0x253   : > { %v917_v8 = vadd.f32 %v3015_v4, %v908_v5  ;;  %v900_v9 = vmul.f32 %v3500_v6, %v876_v46 }
 0x255   : > { %v924_v10 = vpack.c.bf16 %v917_v8, %v916_v7  ;;  %v909_v11 = vmul.f32 %v3014_v63, %v900_v9 }
 0x257   : > { %3245 = vmatprep.mubr.msk.bf16.mxu1 %vm859_vm1, %v924_v10  ;;  %v918_v12 = vadd.f32 %v3015_v4, %v909_v11  ;;  %v3463_v4 = vld [vmem:[%s4236_s7] sm:$0xff]  }
 0x259   : > { %v925_v13 = vpack.c.bf16 %v918_v12, %v918_v12 }
 0x25b   : > { %3246 = vmatmul.mubr.msk.bf16.vlgmr.msra.gmra.mrb[0].mxu1 %vm859_vm1, %v925_v13 }
 0x32e   : > { %v3247_v15 = vpop.f32.mrb[0].mxu1 }
 0x32f   : > { %v993_v16 = vadd.f32 %v3247_v15, %v3016_v14  ;;  %v984_v17 = vpop.f32.mrb[1].mxu1 }
 0x330   : > { %v3248_v18 = vpop.f32.mrb[2].mxu1  ;;  %v985_v22 = vadd.f32 %v3016_v14, %v984_v17 }
 0x331   : > { %v3824_v19 = vpack.c.bf16 %v993_v16, %v993_v16  ;;  %v987_v20 = vpop.f32.mrb[3].mxu1 }
 0x332   : > { %v988_v23 = vadd.f32 %v3016_v14, %v987_v20 }
 0x333   : > { %1009 = vrot.lane.b32.xlu1 %v3824_v19, %s4267_s26 }
 0x334   : > { %v3828_v25 = vpack.c.bf16 %v988_v23, %v985_v22 }
 0x336   : > { %1007 = vrot.lane.b32.xlu0 %v3828_v25, %s4267_s26  ;;  %3253 = vmatprep.mubr.msk.bf16.mxu1 %vm1011_vm3, %v3828_v25 }
 0x3a5   : > { %v1010_v28 = vpop.permute.xlu1 %1009 }
 0x3a6   : > { %v1022_v29 = vsel %vm1011_vm3, %v1010_v28, 0 }
 0x3a8   : > { %v1008_v26 = vpop.permute.xlu0 %1007 }
 0x3a9   : > { %v1019_v27 = vsel %vm1011_vm3, %v1008_v26, 0  ;;  %3421 = vmatprep.subr.msk.bf16.mxu1 %vm1011_vm3, %v1008_v26 }
 0x3aa   : > { %3250 = vmatpush3.bf16.xpose.msra.mxu1 %v1019_v27 }
 0x3ab   : > { %3422 = vmatprep.subr.msk.bf16.mxu1 %vm1011_vm3, %v1010_v28 }
 0x3b2   : > { %3252 = vmatpush3.bf16.xpose.msra.mxu1 %v1022_v29 }
 0x3b9   : > { %3254 = vmatmul.mubr.msk.bf16.vlgmr.msra.gmra.mrb[4].mxu1 %vm1011_vm3, %v3824_v19 }
 0x48c   : > { %v3255_v31 = vpop.f32.mrb[4].mxu1 }
 0x48d   : > { %v1074_v33 = vmul.f32 0.25, %v3255_v31  ;;  %v1058_v34 = vpop.f32.mrb[5].mxu1 }
 0x48e   : > { %v1072_v36 = vmul.f32 0.25, %v1058_v34  ;;  %v3256_v37 = vpop.f32.mrb[6].mxu1 }
 0x48f   : > { %v1061_v38 = vpop.f32.mrb[7].mxu1  ;;  %v1080_v39 = vadd.f32 %v1077_v32, %v1074_v33 }
 0x490   : > { %v1073_v41 = vmul.f32 0.25, %v1061_v38  ;;  %v1078_v42 = vadd.f32 %v1075_v35, %v1072_v36  ;;  %v3033_v36 = vld [vmem:[%s4238_s9 + $0x28] sm:$0x1] }
 0x491   : > { %v1089_v43 = vsel %vm1088_vm4, %v1080_v39, -inf }
 0x492   : > { %1090 = vmax.xlane.f32.xlu0 %v1089_v43  ;;  %v1082_v44 = vsel %vm1081_vm5, %v1078_v42, -inf  ;;  %v1079_v45 = vadd.f32 %v1076_v40, %v1073_v41  ;;  %v3031_v41 = vld [vmem:[%s4238_s9 + $0x18] sm:$0xff] }
 0x493   : > { %1083 = vmax.xlane.f32.xlu1 %v1082_v44  ;;  %v3032_v44 = vld [vmem:[%s4238_s9 + $0x20] sm:$0xff] }
 0x494   : > { %v1085_v46 = vsel %vm1081_vm5, %v1079_v45, -inf }
 0x496   : > { %1086 = vmax.xlane.f32.xlu0 %v1085_v46 }
 0x4a4   : > { %1115 = vrot.lane.b32.xlu1 %v3828_v25, %s4263_s27 }
 0x4ac   : > { %1117 = vrot.lane.b32.xlu0 %v3824_v19, %s4263_s27 }
 0x51f   : > { %v1091_v47 = vpop.xlane.xlu0 %1090 }
 0x520   : > { %v1094_v48 = vsub.f32 %v1080_v39, %v1091_v47  ;;  %v1084_v49 = vpop.xlane.xlu1 %1083 }
 0x521   : > { %v1092_v50 = vsub.f32 %v1078_v42, %v1084_v49 }
 0x522   : > { %v1099_v51 = vmul.f32 1.442695, %v1094_v48 }
 0x523   : > { %v1095_v52 = vmul.f32 1.442695, %v1092_v50  ;;  %v1087_v53 = vpop.xlane.xlu0 %1086 }
 0x524   : > { %v1093_v54 = vsub.f32 %v1079_v45, %v1087_v53  ;;  %v1116_v55 = vpop.permute.xlu1 %1115 }
 0x525   : > { %3501 = vpow2.f32 %v1095_v52  ;;  %3257 = vmatprep.subr.bf16.mxu1 %v1116_v55 }
 0x526   : > { %v1097_v57 = vmul.f32 1.442695, %v1093_v54  ;;  %3258 = vmatpush3.bf16.msra.mxu1 %v1116_v55  ;;  %3503 = vpow2.f32 %v1099_v51 }
 0x527   : > { %v1118_v58 = vpop.permute.xlu0 %1117 }
 0x528   : > { %3505 = vpow2.f32 %v1097_v57  ;;  %v1130_v59 = vand.u32 %v3857_v56, %v1118_v58 }
 0x52a   : > { %3259 = vmatprep.subr.bf16.mxu1 %v1130_v59 }
 0x52b   : > { %3260 = vmatpush3.bf16.msra.mxu1 %v1130_v59 }
 0x52c   : > { %3265 = vmatprep.subr.bf16.mxu1 %v3463_v4 }
 0x52f   : > { %v3502_v60 = vpop.eup %3501 }
 0x530   : > { %v1101_v61 = vsel %vm1081_vm5, %v3502_v60, 0.0  ;;  %v3504_v62 = vpop.eup %3503 }
 0x531   : > { %1102 = vadd.xlane.f32.xlu1 %v1101_v61  ;;  %v1107_v1 = vsel %vm1088_vm4, %v3504_v62, 0.0  ;;  %v1114_v3 = vpack.c.bf16 %v3504_v62, %v3504_v62 }
 0x532   : > { %v3506_v63 = vpop.eup %3505 }
 0x533   : > { %v1104_v0 = vsel %vm1081_vm5, %v3506_v63, 0.0  ;;  %v1113_v2 = vpack.c.bf16 %v3506_v63, %v3502_v60 }
 0x534   : > { %1105 = vadd.xlane.f32.xlu0 %v1104_v0 }
 0x535   : > { %1108 = vadd.xlane.f32.xlu1 %v1107_v1  ;;  %3261 = vmatprep.mubr.msk.bf16.mxu1 %vm1081_vm5, %v1113_v2 }
 0x536   : > { %3262 = vmatmul.mubr.msk.bf16.vlgmr.msra.gmra.mrb[8].mxu1 %vm1081_vm5, %v1114_v3 }
 0x537   : > { %3266 = vmatpush3.bf16.msra.mxu1 %v3463_v4 }
 0x546   : > { %1260 = vrot.lane.b32.xlu1 %v3824_v19, %s4261_s0 }
 0x54a   : > { %1254 = vrot.lane.b32.xlu1 %v3828_v25, %s4259_s1  ;;  %1258 = vrot.lane.b32.xlu0 %v3828_v25, %s4261_s0  ;;  %s4289_s0 = smul.u32 24, %s4291_s28 }
 0x54e   : > { %1256 = vrot.lane.b32.xlu1 %v3824_v19, %s4259_s1  ;;  %s4265_s1 = smov 48  }
 0x5be   : > { %v1103_v7 = vpop.xlane.xlu1 %1102 }
 0x5bf   : > { %3507 = vrcp.f32 %v1103_v7 }
 0x5c1   : > { %v1106_v5 = vpop.xlane.xlu0 %1105 }
 0x5c2   : > { %v1109_v8 = vpop.xlane.xlu1 %1108 }
 0x5c3   : > { %3509 = vrcp.f32 %v1109_v8 }
 0x5c4   : > { %3511 = vrcp.f32 %v1106_v5 }
 0x5c5   : > { %v1259_v6 = vpop.permute.xlu0 %1258 }
 0x5c6   : > { %3423 = vmatprep.subr.msk.bf16.mxu1 %vm1011_vm3, %v1259_v6  ;;  %v1261_v15 = vpop.permute.xlu1 %1260  ;;  %v1269_v26 = vsel %vm1011_vm3, %v1259_v6, 0  ;;  %v3464_v6 = vld [vmem:[%s4236_s7 + $0x8] sm:$0xff]  }
 0x5c7   : > { %v1272_v28 = vsel %vm1011_vm3, %v1261_v15, 0 }
 0x5c9   : > { %v3508_v10 = vpop.eup %3507 }
 0x5ca   : > { %v1255_v27 = vpop.permute.xlu1 %1254 }
 0x5cd   : > { %v3510_v12 = vpop.eup %3509 }
 0x5ce   : > { %v3512_v14 = vpop.eup %3511  ;;  %v1257_v29 = vpop.permute.xlu1 %1256 }
 0x609   : > { %v3263_v9 = vpop.f32.mrb[8].mxu1 }
 0x60a   : > { %v1166_v11 = vpop.f32.mrb[9].mxu1  ;;  %v1182_v16 = vmul.f32 %v3510_v12, %v3263_v9 }
 0x60b   : > { %v3264_v13 = vpop.f32.mrb[10].mxu1  ;;  %v1180_v18 = vmul.f32 %v3508_v10, %v1166_v11 }
 0x60c   : > { %v1169_v17 = vpop.f32.mrb[11].mxu1  ;;  %v1184_v23 = vpack.c.bf16 %v1182_v16, %v1182_v16 }
 0x60d   : > { %v1181_v20 = vmul.f32 %v3512_v14, %v1169_v17 }
 0x60f   : > { %v1183_v22 = vpack.c.bf16 %v1181_v20, %v1180_v18 }
 0x611   : > { %3267 = vmatprep.mubr.msk.bf16.mxu1 %vm1011_vm3, %v1183_v22 }
 0x612   : > { %3268 = vmatmul.mubr.msk.bf16.vlgmr.msra.gmra.mrb[12].mxu1 %vm1011_vm3, %v1184_v23 }
 0x613   : > { %3272 = vmatpush3.bf16.xpose.msra.mxu1 %v1269_v26  ;;  %3275 = vmatprep.mubr.msk.bf16.mxu1 %vm1011_vm3, %v1255_v27  ;;  %v3028_v26 = vld [vmem:[%s4237_s8] ss:$0 sm:$0xff] }
 0x614   : > { %3424 = vmatprep.subr.msk.bf16.mxu1 %vm1011_vm3, %v1261_v15 }
 0x61b   : > { %3274 = vmatpush3.bf16.xpose.msra.mxu1 %v1272_v28 }
 0x61c   : > { %3287 = vmatprep.subr.bf16.mxu1 %v3464_v6 }
 0x622   : > { %3276 = vmatmul.mubr.msk.bf16.vlgmr.msra.gmra.mrb[16].mxu1 %vm1011_vm3, %v1257_v29 }
 0x623   : > { %3288 = vmatpush3.bf16.msra.mxu1 %v3464_v6 }
 0x6e5   : > { %v3884_v31 = vpop.f32.mrb[12].mxu1 }
 0x6e6   : > { %v3886_v32 = vpop.f32.mrb[13].mxu1  ;;  %v1253_v27 = vadd.f32 %v3884_v31, %v3028_v26 }
 0x6e7   : > { %v3270_v33 = vpop.f32.mrb[14].mxu1  ;;  %v1251_v28 = vadd.f32 %v3028_v26, %v3886_v32 }
 0x6e8   : > { %v3888_v34 = vpop.f32.mrb[15].mxu1 }
 0x6f5   : > { %v3277_v35 = vpop.f32.mrb[16].mxu1 }
 0x6f6   : > { %v1324_v37 = vmul.f32 0.25, %v3277_v35  ;;  %v1308_v38 = vpop.f32.mrb[17].mxu1 }
 0x6f7   : > { %v1322_v39 = vmul.f32 0.25, %v1308_v38  ;;  %v3278_v40 = vpop.f32.mrb[18].mxu1 }
 0x6f8   : > { %v1311_v42 = vpop.f32.mrb[19].mxu1  ;;  %v1331_v43 = vadd.f32 %v3033_v36, %v1324_v37  ;;  %v1252_v36 = vadd.f32 %v3028_v26, %v3888_v34  ;;  %v3471_v26 = vld [vmem:[%s4243_s14 + $0x20] sm:$0xff]  }
 0x6f9   : > { %v1323_v45 = vmul.f32 0.25, %v1311_v42  ;;  %v1329_v47 = vadd.f32 %v3031_v41, %v1322_v39 }
 0x6fa   : > { %v1338_v46 = vsel %vm1088_vm4, %v1331_v43, -inf }
 0x6fb   : > { %1339 = vmax.xlane.f32.xlu0 %v1338_v46  ;;  %v1330_v48 = vadd.f32 %v3032_v44, %v1323_v45  ;;  %v1332_v50 = vsel %vm1081_vm5, %v1329_v47, -inf }
 0x6fd   : > { %v1335_v49 = vsel %vm1081_vm5, %v1330_v48, -inf }
 0x6fe   : > { %1336 = vmax.xlane.f32.xlu1 %v1335_v49 }
 0x6ff   : > { %1333 = vmax.xlane.f32.xlu0 %v1332_v50 }
 0x70f   : > { %1366 = vrot.lane.b32.xlu1 %v3824_v19, %s4265_s1 }
 0x715   : > { %1364 = vrot.lane.b32.xlu0 %v3828_v25, %s4265_s1  ;;  %s4287_s1 = smov 112  }
 0x788   : > { %v1340_v51 = vpop.xlane.xlu0 %1339 }
 0x789   : > { %v1343_v52 = vsub.f32 %v1331_v43, %v1340_v51 }
 0x78b   : > { %v1348_v53 = vmul.f32 1.442695, %v1343_v52  ;;  %v1337_v54 = vpop.xlane.xlu1 %1336 }
 0x78c   : > { %v1342_v55 = vsub.f32 %v1330_v48, %v1337_v54  ;;  %v1334_v57 = vpop.xlane.xlu0 %1333 }
 0x78d   : > { %v1341_v58 = vsub.f32 %v1329_v47, %v1334_v57  ;;  %3513 = vpow2.f32 %v1348_v53  ;;  %v3465_v57 = vld [vmem:[%s4241_s12] sm:$0xff]  }
 0x78e   : > { %v1346_v59 = vmul.f32 1.442695, %v1342_v55 }
 0x78f   : > { %v1344_v60 = vmul.f32 1.442695, %v1341_v58  ;;  %v1367_v61 = vpop.permute.xlu1 %1366  ;;  %v3466_v58 = vld [vmem:[%s4241_s12 + $0x8] sm:$0xff]  }
 0x790   : > { %3515 = vpow2.f32 %v1346_v59  ;;  %v1376_v62 = vand.u32 %v1367_v61, %v3857_v56  ;;  %v1365_v63 = vpop.permute.xlu0 %1364  ;;  %v3467_v59 = vld [vmem:[%s4243_s14] sm:$0xff]  }
 0x791   : > { %3517 = vpow2.f32 %v1344_v60  ;;  %3279 = vmatprep.subr.bf16.mxu0 %v1365_v63  ;;  %v3468_v60 = vld [vmem:[%s4243_s14 + $0x8] sm:$0xff]   ;;  %3301 = vmatprep.subr.bf16.mxu1 %v3467_v59 }
 0x792   : > { %3280 = vmatpush3.bf16.msra.mxu0 %v1365_v63 }
 0x793   : > { %3281 = vmatprep.subr.bf16.mxu0 %v1376_v62 }
 0x796   : > { %3282 = vmatpush3.bf16.msra.mxu0 %v1376_v62 }
 0x797   : > { %v3514_v19 = vpop.eup %3513  ;;  %3293 = vmatprep.subr.bf16.mxu0 %v3465_v57 }
 0x798   : > { %v1363_v4 = vpack.c.bf16 %v3514_v19, %v3514_v19  ;;  %v1356_v5 = vsel %vm1088_vm4, %v3514_v19, 0.0 }
 0x79a   : > { %v3516_v25 = vpop.eup %3515 }
 0x79b   : > { %v3518_v0 = vpop.eup %3517  ;;  %v1353_v2 = vsel %vm1081_vm5, %v3516_v25, 0.0 }
 0x79c   : > { %1354 = vadd.xlane.f32.xlu0 %v1353_v2  ;;  %v1350_v1 = vsel %vm1081_vm5, %v3518_v0, 0.0  ;;  %v1362_v3 = vpack.c.bf16 %v3516_v25, %v3518_v0 }
 0x79d   : > { %1351 = vadd.xlane.f32.xlu1 %v1350_v1 }
 0x79e   : > { %3283 = vmatprep.mubr.msk.bf16.mxu0 %vm1081_vm5, %v1362_v3 }
 0x79f   : > { %3284 = vmatmul.mubr.msk.bf16.vlgmr.msra.gmra.mrb[8].mxu0 %vm1081_vm5, %v1363_v4 }
 0x7a0   : > { %1357 = vadd.xlane.f32.xlu0 %v1356_v5  ;;  %3294 = vmatpush3.bf16.msra.mxu0 %v3465_v57  ;;  %v3039_v5 = vld [vmem:[%s4239_s10] ss:$0 sm:$0xff] }
 0x7a1   : > { %3295 = vmatprep.subr.bf16.mxu0 %v3466_v58  ;;  %v3046_v57 = vld [vmem:[%s4244_s15] ss:$0 sm:$0xff] }
 0x7a4   : > { %3296 = vmatpush3.bf16.msra.mxu0 %v3466_v58 }
 0x829   : > { %v1355_v7 = vpop.xlane.xlu0 %1354 }
 0x82a   : > { %v1352_v9 = vpop.xlane.xlu1 %1351  ;;  %3519 = vrcp.f32 %v1355_v7 }
 0x82d   : > { %v1358_v8 = vpop.xlane.xlu0 %1357 }
 0x82e   : > { %3521 = vrcp.f32 %v1358_v8 }
 0x82f   : > { %3523 = vrcp.f32 %v1352_v9 }
 0x834   : > { %v3520_v11 = vpop.eup %3519 }
 0x838   : > { %v3522_v13 = vpop.eup %3521 }
 0x839   : > { %v3524_v15 = vpop.eup %3523 }
 0x872   : > { %v3285_v10 = vpop.f32.mrb[8].mxu0 }
 0x873   : > { %v1412_v12 = vpop.f32.mrb[9].mxu0  ;;  %v1428_v16 = vmul.f32 %v3522_v13, %v3285_v10 }
 0x874   : > { %v3286_v14 = vpop.f32.mrb[10].mxu0  ;;  %v1426_v18 = vmul.f32 %v3524_v15, %v1412_v12 }
 0x875   : > { %v1415_v17 = vpop.f32.mrb[11].mxu0  ;;  %v1430_v23 = vpack.c.bf16 %v1428_v16, %v1428_v16 }
 0x876   : > { %v1427_v20 = vmul.f32 %v3520_v11, %v1415_v17  ;;  %v3040_v11 = vld [vmem:[%s4240_s11] ss:$0 sm:$0xff] }
 0x878   : > { %v1429_v22 = vpack.c.bf16 %v1427_v20, %v1426_v18 }
 0x87a   : > { %3289 = vmatprep.mubr.msk.bf16.mxu1 %vm1011_vm3, %v1429_v22  ;;  %v3469_v22 = vld [vmem:[%s4243_s14 + $0x10] sm:$0xff]  }
 0x87b   : > { %3290 = vmatmul.mubr.msk.bf16.vlgmr.msra.gmra.mrb[20].mxu1 %vm1011_vm3, %v1430_v23  ;;  %v3470_v23 = vld [vmem:[%s4243_s14 + $0x18] sm:$0xff]  }
 0x87c   : > { %3302 = vmatpush3.bf16.msra.mxu1 %v3467_v59 }
 0x87d   : > { %3303 = vmatprep.subr.bf16.mxu1 %v3468_v60 }
 0x880   : > { %3304 = vmatpush3.bf16.msra.mxu1 %v3468_v60 }
 0x881   : > { %3305 = vmatprep.subr.bf16.mxu1 %v3469_v22 }
 0x884   : > { %3306 = vmatpush3.bf16.msra.mxu1 %v3469_v22 }
 0x885   : > { %3307 = vmatprep.subr.bf16.mxu1 %v3470_v23 }
 0x888   : > { %3308 = vmatpush3.bf16.msra.mxu1 %v3470_v23 }
 0x889   : > { %3309 = vmatprep.subr.bf16.mxu1 %v3471_v26 }
 0x88c   : > { %3310 = vmatpush3.bf16.msra.mxu1 %v3471_v26 }
 0x94e   : > { %v3291_v29 = vpop.f32.mrb[20].mxu1 }
 0x94f   : > { %v1493_v33 = vadd.f32 %v3291_v29, %v1253_v27  ;;  %v1477_v35 = vpop.f32.mrb[21].mxu1  ;;  %v3472_v27 = vld [vmem:[%s4243_s14 + $0x28] sm:$0xff]   ;;  %v3474_v29 = vld [vmem:[%s4243_s14 + $0x38] sm:$0xff]  }
 0x950   : > { %v1491_v37 = vadd.f32 %v1477_v35, %v1251_v28  ;;  %v3292_v38 = vpop.f32.mrb[22].mxu1  ;;  %3311 = vmatprep.subr.bf16.mxu1 %v3472_v27  ;;  %v3473_v28 = vld [vmem:[%s4243_s14 + $0x30] sm:$0xff]  }
 0x951   : > { %v1480_v39 = vpop.f32.mrb[23].mxu1  ;;  %v3927_v42 = vadd.f32 %v1493_v33, %v3797_v30  ;;  %3312 = vmatpush3.bf16.msra.mxu1 %v3472_v27  ;;  %v3041_v33 = vld [vmem:[%s4242_s13] ss:$0 sm:$0xff] }
 0x952   : > { %v3924_v40 = vadd.f32 %v1491_v37, %v3786_v21  ;;  %v1492_v41 = vadd.f32 %v1480_v39, %v1252_v36  ;;  %3313 = vmatprep.subr.bf16.mxu1 %v3473_v28 }
 0x953   : > { %v1505_v34 = vsel %vm866_vm2, %v3927_v42, 0.0 }
 0x954   : > { %v3930_v43 = vadd.f32 %v1492_v41, %v3788_v24  ;;  %v1499_v31 = vsel %vm859_vm1, %v3924_v40, 0.0 }
 0x955   : > { %1500 = vadd.xlane.f32.xlu0 %v1499_v31  ;;  %3314 = vmatpush3.bf16.msra.mxu1 %v3473_v28 }
 0x956   : > { %v1502_v32 = vsel %vm859_vm1, %v3930_v43, 0.0  ;;  %3315 = vmatprep.subr.bf16.mxu1 %v3474_v29 }
 0x957   : > { %1503 = vadd.xlane.f32.xlu1 %v1502_v32 }
 0x959   : > { %1506 = vadd.xlane.f32.xlu0 %v1505_v34  ;;  %3316 = vmatpush3.bf16.msra.mxu1 %v3474_v29 }
 0x9e2   : > { %v1501_v21 = vpop.xlane.xlu0 %1500 }
 0x9e3   : > { %v1508_v44 = vmul.f32 0.03125, %v1501_v21 }
 0x9e4   : > { %v1504_v45 = vpop.xlane.xlu1 %1503 }
 0x9e5   : > { %v1511_v30 = vsub.f32 %v3924_v40, %v1508_v44  ;;  %v1509_v46 = vmul.f32 0.03125, %v1504_v45 }
 0x9e6   : > { %v1507_v24 = vpop.xlane.xlu0 %1506 }
 0x9e7   : > { %v1512_v47 = vsub.f32 %v3930_v43, %v1509_v46  ;;  %v1510_v48 = vmul.f32 0.03125, %v1507_v24  ;;  %v1514_v49 = vmul.f32 %v1511_v30, %v1511_v30 }
 0x9e9   : > { %v1513_v50 = vsub.f32 %v3927_v42, %v1510_v48  ;;  %v1517_v51 = vsel %vm859_vm1, %v1514_v49, 0.0  ;;  %v1515_v52 = vmul.f32 %v1512_v47, %v1512_v47 }
 0x9ea   : > { %1518 = vadd.xlane.f32.xlu1 %v1517_v51 }
 0x9eb   : > { %v1520_v53 = vsel %vm859_vm1, %v1515_v52, 0.0  ;;  %v1516_v54 = vmul.f32 %v1513_v50, %v1513_v50 }
 0x9ec   : > { %1521 = vadd.xlane.f32.xlu0 %v1520_v53 }
 0x9ed   : > { %v1523_v55 = vsel %vm866_vm2, %v1516_v54, 0.0 }
 0x9ee   : > { %1524 = vadd.xlane.f32.xlu1 %v1523_v55 }
 0xa77   : > { %v1519_v61 = vpop.xlane.xlu1 %1518 }
 0xa78   : > { %v1526_v62 = vmul.f32 0.03125, %v1519_v61 }
 0xa79   : > { %v1522_v63 = vpop.xlane.xlu0 %1521 }
 0xa7a   : > { %v1529_v19 = vadd.f32 1e-12, %v1526_v62  ;;  %v1527_v25 = vmul.f32 0.03125, %v1522_v63 }
 0xa7b   : > { %v1525_v0 = vpop.xlane.xlu1 %1524 }
 0xa7c   : > { %3525 = vrsqrt.f32 %v1529_v19  ;;  %v1530_v2 = vadd.f32 1e-12, %v1527_v25  ;;  %v1528_v1 = vmul.f32 0.03125, %v1525_v0 }
 0xa7e   : > { %3527 = vrsqrt.f32 %v1530_v2  ;;  %v1531_v3 = vadd.f32 1e-12, %v1528_v1 }
 0xa80   : > { %3529 = vrsqrt.f32 %v1531_v3 }
 0xa86   : > { %v3526_v4 = vpop.eup %3525 }
 0xa87   : > { %v1535_v6 = vmul.f32 %v3526_v4, %v1511_v30 }
 0xa88   : > { %v3528_v7 = vpop.eup %3527 }
 0xa89   : > { %v1536_v8 = vmul.f32 %v3528_v7, %v1512_v47  ;;  %v1544_v9 = vmul.f32 %v3039_v5, %v1535_v6 }
 0xa8a   : > { %v3530_v10 = vpop.eup %3529 }
 0xa8b   : > { %v1537_v12 = vmul.f32 %v3530_v10, %v1513_v50  ;;  %v1545_v13 = vmul.f32 %v3039_v5, %v1536_v8  ;;  %v1553_v14 = vadd.f32 %v3040_v11, %v1544_v9 }
 0xa8d   : > { %v1554_v15 = vadd.f32 %v3040_v11, %v1545_v13  ;;  %v1546_v16 = vmul.f32 %v3039_v5, %v1537_v12 }
 0xa8f   : > { %v1561_v17 = vpack.c.bf16 %v1554_v15, %v1553_v14  ;;  %v1555_v18 = vadd.f32 %v3040_v11, %v1546_v16 }
 0xa91   : > { %3297 = vmatprep.mubr.msk.bf16.mxu0 %vm859_vm1, %v1561_v17  ;;  %v1562_v20 = vpack.c.bf16 %v1555_v18, %v1555_v18  ;;  %v3475_v17 = vld [vmem:[%s4280_s5 + $0x10] sm:$0xff]   ;;  %v3476_v18 = vld [vmem:[%s4280_s5 + $0x18] sm:$0xff]  }
 0xa92   : > { %3321 = vmatprep.subr.bf16.mxu0 %v3475_v17 }
 0xa93   : > { %3298 = vmatmul.mubr.msk.bf16.vlgmr.msra.gmra.mrb[12].mxu0 %vm859_vm1, %v1562_v20 }
 0xa94   : > { %3322 = vmatpush3.bf16.msra.mxu0 %v3475_v17 }
 0xa95   : > { %3323 = vmatprep.subr.bf16.mxu0 %v3476_v18 }
 0xa98   : > { %3324 = vmatpush3.bf16.msra.mxu0 %v3476_v18 }
 0xb66   : > { %v3299_v35 = vpop.f32.mrb[12].mxu0 }
 0xb67   : > { %v1630_v36 = vadd.f32 %v3299_v35, %v3041_v33  ;;  %v1621_v37 = vpop.f32.mrb[13].mxu0 }
 0xb68   : > { %v1622_v38 = vadd.f32 %v3041_v33, %v1621_v37  ;;  %v3300_v39 = vpop.f32.mrb[14].mxu0  ;;  %v3057_v37 = vld [vmem:[%s4281_s30 + $0x1] ss:$0 sm:$0xff] }
 0xb69   : > { %v1640_v41 = vmul.f32 0.70710677, %v1630_v36  ;;  %v1624_v31 = vpop.f32.mrb[15].mxu0  ;;  %v1637_v47 = vmul.f32 0.5, %v1630_v36 }
 0xb6a   : > { %v1638_v32 = vmul.f32 0.70710677, %v1622_v38  ;;  %v1625_v34 = vadd.f32 %v3041_v33, %v1624_v31  ;;  %v1635_v48 = vmul.f32 0.5, %v1622_v38 }
 0xb6b   : > { %3531 = verf.f32 %v1640_v41 }
 0xb6c   : > { %3533 = verf.f32 %v1638_v32  ;;  %v1639_v21 = vmul.f32 0.70710677, %v1625_v34  ;;  %v1636_v49 = vmul.f32 0.5, %v1625_v34  ;;  %v3058_v34 = vld [vmem:[%s4282_s23 + $0x1] ss:$0 sm:$0xff] }
 0xb6e   : > { %3535 = verf.f32 %v1639_v21 }
 0xb75   : > { %v3532_v44 = vpop.eup %3531 }
 0xb76   : > { %v3534_v45 = vpop.eup %3533  ;;  %v1646_v30 = vadd.f32 1.0, %v3532_v44 }
 0xb77   : > { %v1644_v46 = vadd.f32 1.0, %v3534_v45 }
 0xb78   : > { %v3536_v24 = vpop.eup %3535  ;;  %v1649_v51 = vmul.f32 %v1646_v30, %v1637_v47 }
 0xb79   : > { %v1645_v50 = vadd.f32 1.0, %v3536_v24  ;;  %v1647_v52 = vmul.f32 %v1644_v46, %v1635_v48 }
 0xb7a   : > { %v1668_v55 = vpack.c.bf16 %v1649_v51, %v1649_v51 }
 0xb7b   : > { %v1648_v53 = vmul.f32 %v1645_v50, %v1636_v49  ;;  %v3064_v49 = vld [vmem:[%s4283_s25 + $0x1] ss:$0 sm:$0xff] }
 0xb7d   : > { %v1667_v54 = vpack.c.bf16 %v1648_v53, %v1647_v52 }
 0xb7f   : > { %3317 = vmatprep.mubr.bf16.mxu1 %v1667_v54 }
 0xb80   : > { %3318 = vmatmul.mubr.bf16.vlgmr.msra.gmra.mrb[24].mxu1 %v1668_v55 }
 0xc53   : > { %v3319_v58 = vpop.f32.mrb[24].mxu1 }
 0xc54   : > { %v1757_v59 = vpop.f32.mrb[25].mxu1  ;;  %v1766_v60 = vadd.f32 %v3319_v58, %v3046_v57 }
 0xc55   : > { %v1758_v61 = vadd.f32 %v3046_v57, %v1757_v59  ;;  %v3320_v62 = vpop.f32.mrb[26].mxu1 }
 0xc56   : > { %v1760_v63 = vpop.f32.mrb[27].mxu1  ;;  %v3992_v0 = vadd.f32 %v1766_v60, %v3927_v42 }
 0xc57   : > { %v3989_v19 = vadd.f32 %v1758_v61, %v3924_v40  ;;  %v1761_v25 = vadd.f32 %v3046_v57, %v1760_v63 }
 0xc58   : > { %v1784_v4 = vsel %vm866_vm2, %v3992_v0, 0.0 }
 0xc59   : > { %v3995_v2 = vadd.f32 %v1761_v25, %v3930_v43  ;;  %v1778_v1 = vsel %vm859_vm1, %v3989_v19, 0.0 }
 0xc5a   : > { %1779 = vadd.xlane.f32.xlu0 %v1778_v1 }
 0xc5b   : > { %v1781_v3 = vsel %vm859_vm1, %v3995_v2, 0.0 }
 0xc5c   : > { %1782 = vadd.xlane.f32.xlu1 %v1781_v3  ;;  %v3078_v3 = vld [vmem:[%s4238_s9 + $0x40] sm:$0x1] }
 0xc5e   : > { %1785 = vadd.xlane.f32.xlu0 %v1784_v4 }
 0xce7   : > { %v1780_v40 = vpop.xlane.xlu0 %1779 }
 0xce8   : > { %v1787_v5 = vmul.f32 0.03125, %v1780_v40 }
 0xce9   : > { %v1783_v6 = vpop.xlane.xlu1 %1782 }
 0xcea   : > { %v1790_v42 = vsub.f32 %v3989_v19, %v1787_v5  ;;  %v1788_v7 = vmul.f32 0.03125, %v1783_v6  ;;  %v3076_v5 = vld [vmem:[%s4238_s9 + $0x30] sm:$0xff] }
 0xceb   : > { %v1786_v43 = vpop.xlane.xlu0 %1785 }
 0xcec   : > { %v1791_v8 = vsub.f32 %v3995_v2, %v1788_v7  ;;  %v1789_v9 = vmul.f32 0.03125, %v1786_v43  ;;  %v1793_v10 = vmul.f32 %v1790_v42, %v1790_v42 }
 0xcee   : > { %v1792_v11 = vsub.f32 %v3992_v0, %v1789_v9  ;;  %v1796_v12 = vsel %vm859_vm1, %v1793_v10, 0.0  ;;  %v1794_v13 = vmul.f32 %v1791_v8, %v1791_v8 }
 0xcef   : > { %1797 = vadd.xlane.f32.xlu1 %v1796_v12 }
 0xcf0   : > { %v1799_v14 = vsel %vm859_vm1, %v1794_v13, 0.0  ;;  %v1795_v15 = vmul.f32 %v1792_v11, %v1792_v11 }
 0xcf1   : > { %1800 = vadd.xlane.f32.xlu0 %v1799_v14 }
 0xcf2   : > { %v1802_v16 = vsel %vm866_vm2, %v1795_v15, 0.0 }
 0xcf3   : > { %1803 = vadd.xlane.f32.xlu1 %v1802_v16 }
 0xd7c   : > { %v1798_v20 = vpop.xlane.xlu1 %1797 }
 0xd7d   : > { %v1805_v22 = vmul.f32 0.03125, %v1798_v20 }
 0xd7e   : > { %v1801_v23 = vpop.xlane.xlu0 %1800 }
 0xd7f   : > { %v1808_v26 = vadd.f32 1e-12, %v1805_v22  ;;  %v1806_v27 = vmul.f32 0.03125, %v1801_v23 }
 0xd80   : > { %v1804_v28 = vpop.xlane.xlu1 %1803 }
 0xd81   : > { %3537 = vrsqrt.f32 %v1808_v26  ;;  %v1809_v29 = vadd.f32 1e-12, %v1806_v27  ;;  %v1807_v33 = vmul.f32 0.03125, %v1804_v28 }
 0xd83   : > { %3539 = vrsqrt.f32 %v1809_v29  ;;  %v1810_v35 = vadd.f32 1e-12, %v1807_v33 }
 0xd85   : > { %3541 = vrsqrt.f32 %v1810_v35 }
 0xd8b   : > { %v3538_v36 = vpop.eup %3537 }
 0xd8c   : > { %v1814_v38 = vmul.f32 %v3538_v36, %v1790_v42 }
 0xd8d   : > { %v3540_v39 = vpop.eup %3539 }
 0xd8e   : > { %v1815_v41 = vmul.f32 %v3540_v39, %v1791_v8  ;;  %v1823_v31 = vmul.f32 %v3057_v37, %v1814_v38  ;;  %v3077_v8 = vld [vmem:[%s4238_s9 + $0x38] sm:$0xff] }
 0xd8f   : > { %v3542_v32 = vpop.eup %3541 }
 0xd90   : > { %v1816_v21 = vmul.f32 %v3542_v32, %v1792_v11  ;;  %v1824_v44 = vmul.f32 %v3057_v37, %v1815_v41  ;;  %v1832_v45 = vadd.f32 %v3058_v34, %v1823_v31 }
 0xd92   : > { %v1833_v30 = vadd.f32 %v3058_v34, %v1824_v44  ;;  %v1825_v46 = vmul.f32 %v3057_v37, %v1816_v21 }
 0xd94   : > { %v1842_v24 = vpack.c.bf16 %v1833_v30, %v1832_v45  ;;  %v1834_v47 = vadd.f32 %v3058_v34, %v1825_v46  ;;  %v3477_v46 = vld [vmem:[%s4236_s7 + $0x10] sm:$0xff]  }
 0xd95   : > { %3345 = vmatprep.subr.bf16.mxu1 %v3477_v46 }
 0xd96   : > { %3325 = vmatprep.mubr.msk.bf16.mxu0 %vm859_vm1, %v1842_v24  ;;  %v1843_v48 = vpack.c.bf16 %v1834_v47, %v1834_v47  ;;  %3346 = vmatpush3.bf16.msra.mxu1 %v3477_v46 }
 0xd98   : > { %3326 = vmatmul.mubr.msk.bf16.vlgmr.msra.gmra.mrb[16].mxu0 %vm859_vm1, %v1843_v48 }
 0xe6b   : > { %v3327_v50 = vpop.f32.mrb[16].mxu0 }
 0xe6c   : > { %v1911_v51 = vadd.f32 %v3327_v50, %v3064_v49  ;;  %v1902_v52 = vpop.f32.mrb[17].mxu0 }
 0xe6d   : > { %v3328_v53 = vpop.f32.mrb[18].mxu0  ;;  %v1903_v57 = vadd.f32 %v3064_v49, %v1902_v52 }
 0xe6e   : > { %v4026_v54 = vpack.c.bf16 %v1911_v51, %v1911_v51  ;;  %v1905_v55 = vpop.f32.mrb[19].mxu0 }
 0xe6f   : > { %v1906_v58 = vadd.f32 %v3064_v49, %v1905_v55 }
 0xe70   : > { %1929 = vrot.lane.b32.xlu1 %v4026_v54, %s4284_s6 }
 0xe71   : > { %v4030_v59 = vpack.c.bf16 %v1906_v58, %v1903_v57 }
 0xe73   : > { %1927 = vrot.lane.b32.xlu0 %v4030_v59, %s4284_s6  ;;  %3333 = vmatprep.mubr.msk.bf16.mxu0 %vm1011_vm3, %v4030_v59  ;;  %s4286_s6 = smov 80  }
 0xe74   : > { %2033 = vrot.lane.b32.xlu1 %v4030_v59, %s4285_s24 }
 0xee2   : > { %v1930_v62 = vpop.permute.xlu1 %1929 }
 0xee3   : > { %v1941_v63 = vsel %vm1011_vm3, %v1930_v62, 0 }
 0xee5   : > { %v1928_v60 = vpop.permute.xlu0 %1927 }
 0xee6   : > { %v1938_v61 = vsel %vm1011_vm3, %v1928_v60, 0  ;;  %3425 = vmatprep.subr.msk.bf16.mxu0 %vm1011_vm3, %v1928_v60  ;;  %v2034_v25 = vpop.permute.xlu1 %2033 }
 0xee7   : > { %3330 = vmatpush3.bf16.xpose.msra.mxu0 %v1938_v61 }
 0xee8   : > { %3426 = vmatprep.subr.msk.bf16.mxu0 %vm1011_vm3, %v1930_v62 }
 0xeef   : > { %3332 = vmatpush3.bf16.xpose.msra.mxu0 %v1941_v63 }
 0xef0   : > { %3337 = vmatprep.subr.bf16.mxu0 %v2034_v25 }
 0xef6   : > { %3334 = vmatmul.mubr.msk.bf16.vlgmr.msra.gmra.mrb[20].mxu0 %vm1011_vm3, %v4026_v54 }
 0xef7   : > { %3338 = vmatpush3.bf16.msra.mxu0 %v2034_v25 }
 0xfc9   : > { %v3335_v1 = vpop.f32.mrb[20].mxu0 }
 0xfca   : > { %v1993_v4 = vmul.f32 0.25, %v3335_v1  ;;  %v1977_v40 = vpop.f32.mrb[21].mxu0  ;;  %v3089_v1 = vld [vmem:[%s4238_s9 + $0x58] sm:$0x1] }
 0xfcb   : > { %v1991_v6 = vmul.f32 0.25, %v1977_v40  ;;  %v3336_v42 = vpop.f32.mrb[22].mxu0 }
 0xfcc   : > { %v1980_v7 = vpop.f32.mrb[23].mxu0  ;;  %v2000_v43 = vadd.f32 %v3078_v3, %v1993_v4 }
 0xfcd   : > { %v1992_v9 = vmul.f32 0.25, %v1980_v7  ;;  %v1998_v10 = vadd.f32 %v3076_v5, %v1991_v6  ;;  %v3087_v6 = vld [vmem:[%s4238_s9 + $0x48] sm:$0xff] }
 0xfce   : > { %v2007_v11 = vsel %vm1088_vm4, %v2000_v43, -inf }
 0xfcf   : > { %2008 = vmax.xlane.f32.xlu0 %v2007_v11  ;;  %v2001_v12 = vsel %vm1081_vm5, %v1998_v10, -inf  ;;  %v1999_v13 = vadd.f32 %v3077_v8, %v1992_v9 }
 0xfd0   : > { %2002 = vmax.xlane.f32.xlu1 %v2001_v12 }
 0xfd1   : > { %v2004_v14 = vsel %vm1081_vm5, %v1999_v13, -inf }
 0xfd3   : > { %2005 = vmax.xlane.f32.xlu0 %v2004_v14 }
 0xfe1   : > { %2173 = vrot.lane.b32.xlu1 %v4030_v59, %s4286_s6 }
 0xfe5   : > { %2175 = vrot.lane.b32.xlu1 %v4026_v54, %s4286_s6 }
 0xfe9   : > { %2169 = vrot.lane.b32.xlu1 %v4030_v59, %s4287_s1  ;;  %2035 = vrot.lane.b32.xlu0 %v4026_v54, %s4285_s24  ;;  %s4288_s24 = smov 48  }
 0xfed   : > { %2171 = vrot.lane.b32.xlu0 %v4026_v54, %s4287_s1 }
0x105c   : > { %v2009_v15 = vpop.xlane.xlu0 %2008 }
0x105d   : > { %v2012_v16 = vsub.f32 %v2000_v43, %v2009_v15  ;;  %v2003_v17 = vpop.xlane.xlu1 %2002  ;;  %v3088_v43 = vld [vmem:[%s4238_s9 + $0x50] sm:$0xff] }
0x105e   : > { %v2010_v18 = vsub.f32 %v1998_v10, %v2003_v17 }
0x105f   : > { %v2017_v20 = vmul.f32 1.442695, %v2012_v16 }
0x1060   : > { %v2013_v22 = vmul.f32 1.442695, %v2010_v18  ;;  %v2006_v23 = vpop.xlane.xlu0 %2005 }
0x1061   : > { %3543 = vpow2.f32 %v2017_v20  ;;  %v2011_v26 = vsub.f32 %v1999_v13, %v2006_v23  ;;  %v2174_v33 = vpop.permute.xlu1 %2173 }
0x1062   : > { %3545 = vpow2.f32 %v2013_v22  ;;  %v2184_v21 = vsel %vm1011_vm3, %v2174_v33, 0 }
0x1063   : > { %v2015_v27 = vmul.f32 1.442695, %v2011_v26 }
0x1064   : > { %v2036_v28 = vpop.permute.xlu0 %2035 }
0x1065   : > { %3547 = vpow2.f32 %v2015_v27  ;;  %v2045_v29 = vand.u32 %v2036_v28, %v3857_v56  ;;  %v2176_v38 = vpop.permute.xlu1 %2175 }
0x1066   : > { %v2187_v45 = vsel %vm1011_vm3, %v2176_v38, 0 }
0x1067   : > { %3339 = vmatprep.subr.bf16.mxu0 %v2045_v29 }
0x1068   : > { %3340 = vmatpush3.bf16.msra.mxu0 %v2045_v29  ;;  %v2172_v30 = vpop.permute.xlu0 %2171 }
0x1069   : > { %3427 = vmatprep.subr.msk.bf16.mxu0 %vm1011_vm3, %v2174_v33  ;;  %v2170_v44 = vpop.permute.xlu1 %2169 }
0x106b   : > { %v3544_v35 = vpop.eup %3543 }
0x106c   : > { %v3546_v36 = vpop.eup %3545  ;;  %v2025_v37 = vsel %vm1088_vm4, %v3544_v35, 0.0  ;;  %v2032_v34 = vpack.c.bf16 %v3544_v35, %v3544_v35 }
0x106d   : > { %2026 = vadd.xlane.f32.xlu0 %v2025_v37  ;;  %v2019_v39 = vsel %vm1081_vm5, %v3546_v36, 0.0 }
0x106e   : > { %2020 = vadd.xlane.f32.xlu1 %v2019_v39 }
0x106f   : > { %v3548_v41 = vpop.eup %3547 }
0x1070   : > { %v2022_v31 = vsel %vm1081_vm5, %v3548_v41, 0.0  ;;  %v2031_v32 = vpack.c.bf16 %v3548_v41, %v3546_v36 }
0x1071   : > { %2023 = vadd.xlane.f32.xlu0 %v2022_v31 }
0x1072   : > { %3341 = vmatprep.mubr.msk.bf16.mxu0 %vm1081_vm5, %v2031_v32 }
0x1073   : > { %3342 = vmatmul.mubr.msk.bf16.vlgmr.msra.gmra.mrb[24].mxu0 %vm1081_vm5, %v2032_v34  ;;  %v3478_v34 = vld [vmem:[%s4236_s7 + $0x18] sm:$0xff]  }
0x1074   : > { %3352 = vmatpush3.bf16.xpose.msra.mxu0 %v2184_v21  ;;  %3355 = vmatprep.mubr.msk.bf16.mxu0 %vm1011_vm3, %v2170_v44 }
0x1075   : > { %3428 = vmatprep.subr.msk.bf16.mxu0 %vm1011_vm3, %v2176_v38 }
0x107c   : > { %3354 = vmatpush3.bf16.xpose.msra.mxu0 %v2187_v45 }
0x1083   : > { %3356 = vmatmul.mubr.msk.bf16.vlgmr.msra.gmra.mrb[28].mxu0 %vm1011_vm3, %v2172_v30 }
0x10fa   : > { %v2027_v24 = vpop.xlane.xlu0 %2026 }
0x10fb   : > { %v2021_v47 = vpop.xlane.xlu1 %2020  ;;  %3549 = vrcp.f32 %v2027_v24 }
0x10fc   : > { %3551 = vrcp.f32 %v2021_v47 }
0x10fe   : > { %v2024_v48 = vpop.xlane.xlu0 %2023 }
0x10ff   : > { %3553 = vrcp.f32 %v2024_v48 }
0x1105   : > { %v3550_v50 = vpop.eup %3549 }
0x1106   : > { %v3552_v52 = vpop.eup %3551 }
0x1109   : > { %v3554_v55 = vpop.eup %3553 }
0x1146   : > { %v3343_v49 = vpop.f32.mrb[24].mxu0 }
0x1147   : > { %v2081_v51 = vpop.f32.mrb[25].mxu0  ;;  %v2097_v57 = vmul.f32 %v3550_v50, %v3343_v49 }
0x1148   : > { %v3344_v53 = vpop.f32.mrb[26].mxu0  ;;  %v2095_v60 = vmul.f32 %v3552_v52, %v2081_v51 }
0x1149   : > { %v2084_v58 = vpop.f32.mrb[27].mxu0  ;;  %v2099_v63 = vpack.c.bf16 %v2097_v57, %v2097_v57 }
0x114a   : > { %v2096_v61 = vmul.f32 %v3554_v55, %v2084_v58  ;;  %v3084_v58 = vld [vmem:[%s4237_s8 + $0x1] ss:$0 sm:$0xff] }
0x114c   : > { %v2098_v62 = vpack.c.bf16 %v2096_v61, %v2095_v60 }
0x114e   : > { %3347 = vmatprep.mubr.msk.bf16.mxu1 %vm1011_vm3, %v2098_v62 }
0x114f   : > { %3348 = vmatmul.mubr.msk.bf16.vlgmr.msra.gmra.mrb[28].mxu1 %vm1011_vm3, %v2099_v63 }
0x1156   : > { %v3357_v25 = vpop.f32.mrb[28].mxu0 }
0x1157   : > { %v2239_v3 = vmul.f32 0.25, %v3357_v25  ;;  %v2223_v4 = vpop.f32.mrb[29].mxu0 }
0x1158   : > { %v2237_v40 = vmul.f32 0.25, %v2223_v4  ;;  %v3358_v5 = vpop.f32.mrb[30].mxu0 }
0x1159   : > { %v2226_v42 = vpop.f32.mrb[31].mxu0  ;;  %v2246_v7 = vadd.f32 %v3089_v1, %v2239_v3 }
0x115a   : > { %v2238_v8 = vmul.f32 0.25, %v2226_v42  ;;  %v2244_v10 = vadd.f32 %v3087_v6, %v2237_v40 }
0x115b   : > { %v2253_v9 = vsel %vm1088_vm4, %v2246_v7, -inf }
0x115c   : > { %2254 = vmax.xlane.f32.xlu0 %v2253_v9  ;;  %v2245_v11 = vadd.f32 %v3088_v43, %v2238_v8  ;;  %v2247_v13 = vsel %vm1081_vm5, %v2244_v10, -inf }
0x115e   : > { %v2250_v12 = vsel %vm1081_vm5, %v2245_v11, -inf }
0x115f   : > { %2251 = vmax.xlane.f32.xlu1 %v2250_v12 }
0x1160   : > { %2248 = vmax.xlane.f32.xlu0 %v2247_v13 }
0x1170   : > { %2279 = vrot.lane.b32.xlu1 %v4030_v59, %s4288_s24 }
0x1176   : > { %2281 = vrot.lane.b32.xlu0 %v4026_v54, %s4288_s24  ;;  %s683_s24 = scalar_lea.vmem %s4251_s22, %s4289_s0 }
0x11e9   : > { %v2255_v14 = vpop.xlane.xlu0 %2254 }
0x11ea   : > { %v2258_v15 = vsub.f32 %v2246_v7, %v2255_v14 }
0x11ec   : > { %v2263_v16 = vmul.f32 1.442695, %v2258_v15  ;;  %v2252_v17 = vpop.xlane.xlu1 %2251 }
0x11ed   : > { %v2257_v18 = vsub.f32 %v2245_v11, %v2252_v17  ;;  %v2249_v20 = vpop.xlane.xlu0 %2248 }
0x11ee   : > { %v2256_v22 = vsub.f32 %v2244_v10, %v2249_v20  ;;  %3555 = vpow2.f32 %v2263_v16 }
0x11ef   : > { %v2261_v23 = vmul.f32 1.442695, %v2257_v18 }
0x11f0   : > { %v2259_v26 = vmul.f32 1.442695, %v2256_v22  ;;  %v2280_v27 = vpop.permute.xlu1 %2279 }
0x11f1   : > { %3557 = vpow2.f32 %v2261_v23  ;;  %3359 = vmatprep.subr.bf16.mxu1 %v2280_v27  ;;  %v2282_v28 = vpop.permute.xlu0 %2281 }
0x11f2   : > { %3559 = vpow2.f32 %v2259_v26  ;;  %v2291_v59 = vand.u32 %v2282_v28, %v3857_v56  ;;  %3360 = vmatpush3.bf16.msra.mxu1 %v2280_v27  ;;  %v3479_v26 = vld [vmem:[%s4241_s12 + $0x10] sm:$0xff]   ;;  %v3480_v27 = vld [vmem:[%s4241_s12 + $0x18] sm:$0xff]   ;;  %v3481_v28 = vld [vmem:[%s4243_s14 + $0x40] sm:$0xff]  }
0x11f3   : > { %3373 = vmatprep.subr.bf16.mxu0 %v3479_v26 }
0x11f4   : > { %3361 = vmatprep.subr.bf16.mxu1 %v2291_v59  ;;  %3374 = vmatpush3.bf16.msra.mxu0 %v3479_v26 }
0x11f5   : > { %3375 = vmatprep.subr.bf16.mxu0 %v3480_v27 }
0x11f6   : > { %3362 = vmatpush3.bf16.msra.mxu1 %v2291_v59  ;;  %v3482_v59 = vld [vmem:[%s4243_s14 + $0x48] sm:$0xff]  }
0x11f7   : > { %3367 = vmatprep.subr.bf16.mxu1 %v3478_v34 }
0x11f8   : > { %v3556_v54 = vpop.eup %3555  ;;  %3376 = vmatpush3.bf16.msra.mxu0 %v3480_v27 }
0x11f9   : > { %v2278_v38 = vpack.c.bf16 %v3556_v54, %v3556_v54  ;;  %v2271_v56 = vsel %vm1088_vm4, %v3556_v54, 0.0 }
0x11fb   : > { %v3558_v29 = vpop.eup %3557 }
0x11fc   : > { %v3560_v33 = vpop.eup %3559  ;;  %v2268_v35 = vsel %vm1081_vm5, %v3558_v29, 0.0 }
0x11fd   : > { %2269 = vadd.xlane.f32.xlu0 %v2268_v35  ;;  %v2265_v36 = vsel %vm1081_vm5, %v3560_v33, 0.0  ;;  %v2277_v37 = vpack.c.bf16 %v3558_v29, %v3560_v33 }
0x11fe   : > { %2266 = vadd.xlane.f32.xlu1 %v2265_v36 }
0x11ff   : > { %3363 = vmatprep.mubr.msk.bf16.mxu1 %vm1081_vm5, %v2277_v37 }
0x1200   : > { %3364 = vmatmul.mubr.msk.bf16.vlgmr.msra.gmra.mrb[32].mxu1 %vm1081_vm5, %v2278_v38 }
0x1201   : > { %3368 = vmatpush3.bf16.msra.mxu1 %v3478_v34 }
0x1202   : > { %2272 = vadd.xlane.f32.xlu1 %v2271_v56  ;;  %3381 = vmatprep.subr.bf16.mxu1 %v3481_v28 }
0x1222   : > { %v3349_v39 = vpop.f32.mrb[28].mxu1 }
0x1223   : > { %v2146_v41 = vpop.f32.mrb[29].mxu1  ;;  %v2168_v60 = vadd.f32 %v3349_v39, %v3084_v58 }
0x1224   : > { %v3350_v31 = vpop.f32.mrb[30].mxu1  ;;  %v2166_v61 = vadd.f32 %v3084_v58, %v2146_v41 }
0x1225   : > { %v2149_v32 = vpop.f32.mrb[31].mxu1  ;;  %v3097_v31 = vld [vmem:[%s4239_s10 + $0x1] ss:$0 sm:$0xff] }
0x1226   : > { %v2167_v1 = vadd.f32 %v3084_v58, %v2149_v32  ;;  %v3486_v58 = vld [vmem:[%s4243_s14 + $0x68] sm:$0xff]  }
0x128a   : > { %v2270_v44 = vpop.xlane.xlu0 %2269 }
0x128b   : > { %v2267_v21 = vpop.xlane.xlu1 %2266  ;;  %3561 = vrcp.f32 %v2270_v44 }
0x128f   : > { %v2273_v45 = vpop.xlane.xlu1 %2272 }
0x1290   : > { %3563 = vrcp.f32 %v2273_v45 }
0x1291   : > { %3565 = vrcp.f32 %v2267_v21 }
0x1295   : > { %v3562_v46 = vpop.eup %3561 }
0x129a   : > { %v3564_v47 = vpop.eup %3563 }
0x129b   : > { %v3566_v49 = vpop.eup %3565 }
0x12d3   : > { %v3365_v30 = vpop.f32.mrb[32].mxu1 }
0x12d4   : > { %v2327_v24 = vpop.f32.mrb[33].mxu1  ;;  %v2343_v50 = vmul.f32 %v3564_v47, %v3365_v30  ;;  %v3098_v30 = vld [vmem:[%s4240_s11 + $0x1] ss:$0 sm:$0xff] }
0x12d5   : > { %v3366_v48 = vpop.f32.mrb[34].mxu1  ;;  %v2341_v52 = vmul.f32 %v3566_v49, %v2327_v24 }
0x12d6   : > { %v2330_v51 = vpop.f32.mrb[35].mxu1  ;;  %v2345_v57 = vpack.c.bf16 %v2343_v50, %v2343_v50 }
0x12d7   : > { %v2342_v53 = vmul.f32 %v3562_v46, %v2330_v51 }
0x12d9   : > { %v2344_v55 = vpack.c.bf16 %v2342_v53, %v2341_v52  ;;  %v3483_v53 = vld [vmem:[%s4243_s14 + $0x50] sm:$0xff]  }
0x12db   : > { %3369 = vmatprep.mubr.msk.bf16.mxu1 %vm1011_vm3, %v2344_v55  ;;  %v3484_v55 = vld [vmem:[%s4243_s14 + $0x58] sm:$0xff]  }
0x12dc   : > { %3370 = vmatmul.mubr.msk.bf16.vlgmr.msra.gmra.mrb[36].mxu1 %vm1011_vm3, %v2345_v57  ;;  %v3485_v57 = vld [vmem:[%s4243_s14 + $0x60] sm:$0xff]  }
0x12dd   : > { %3382 = vmatpush3.bf16.msra.mxu1 %v3481_v28 }
0x12de   : > { %3383 = vmatprep.subr.bf16.mxu1 %v3482_v59 }
0x12e1   : > { %3384 = vmatpush3.bf16.msra.mxu1 %v3482_v59 }
0x12e2   : > { %3385 = vmatprep.subr.bf16.mxu1 %v3483_v53 }
0x12e5   : > { %3386 = vmatpush3.bf16.msra.mxu1 %v3483_v53 }
0x12e6   : > { %3387 = vmatprep.subr.bf16.mxu1 %v3484_v55 }
0x12e9   : > { %3388 = vmatpush3.bf16.msra.mxu1 %v3484_v55 }
0x12ea   : > { %3389 = vmatprep.subr.bf16.mxu1 %v3485_v57 }
0x12ed   : > { %3390 = vmatpush3.bf16.msra.mxu1 %v3485_v57 }
0x12ee   : > { %3391 = vmatprep.subr.bf16.mxu1 %v3486_v58 }
0x12f1   : > { %3392 = vmatpush3.bf16.msra.mxu1 %v3486_v58 }
0x13af   : > { %v3371_v62 = vpop.f32.mrb[36].mxu1 }
0x13b0   : > { %v2408_v63 = vadd.f32 %v3371_v62, %v2168_v60  ;;  %v2392_v25 = vpop.f32.mrb[37].mxu1  ;;  %v3487_v60 = vld [vmem:[%s4243_s14 + $0x70] sm:$0xff]   ;;  %v3104_v62 = vld [vmem:[%s4242_s13 + $0x1] ss:$0 sm:$0xff] }
0x13b1   : > { %v2406_v3 = vadd.f32 %v2392_v25, %v2166_v61  ;;  %v3372_v4 = vpop.f32.mrb[38].mxu1  ;;  %3393 = vmatprep.subr.bf16.mxu1 %v3487_v60  ;;  %v3488_v61 = vld [vmem:[%s4243_s14 + $0x78] sm:$0xff]  }
0x13b2   : > { %v2395_v40 = vpop.f32.mrb[39].mxu1  ;;  %v4117_v42 = vadd.f32 %v2408_v63, %v3992_v0  ;;  %3394 = vmatpush3.bf16.msra.mxu1 %v3487_v60 }
0x13b3   : > { %v4114_v5 = vadd.f32 %v2406_v3, %v3989_v19  ;;  %v2407_v6 = vadd.f32 %v2395_v40, %v2167_v1  ;;  %3395 = vmatprep.subr.bf16.mxu1 %v3488_v61 }
0x13b4   : > { %v2422_v9 = vsel %vm866_vm2, %v4117_v42, 0.0 }
0x13b5   : > { %v4120_v7 = vadd.f32 %v2407_v6, %v3995_v2  ;;  %v2416_v43 = vsel %vm859_vm1, %v4114_v5, 0.0 }
0x13b6   : > { %2417 = vadd.xlane.f32.xlu0 %v2416_v43  ;;  %3396 = vmatpush3.bf16.msra.mxu1 %v3488_v61 }
0x13b7   : > { %v2419_v8 = vsel %vm859_vm1, %v4120_v7, 0.0 }
0x13b8   : > { %2420 = vadd.xlane.f32.xlu1 %v2419_v8 }
0x13ba   : > { %2423 = vadd.xlane.f32.xlu0 %v2422_v9 }
0x1443   : > { %v2418_v19 = vpop.xlane.xlu0 %2417 }
0x1444   : > { %v2425_v10 = vmul.f32 0.03125, %v2418_v19 }
0x1445   : > { %v2421_v11 = vpop.xlane.xlu1 %2420 }
0x1446   : > { %v2428_v0 = vsub.f32 %v4114_v5, %v2425_v10  ;;  %v2426_v12 = vmul.f32 0.03125, %v2421_v11 }
0x1447   : > { %v2424_v2 = vpop.xlane.xlu0 %2423 }
0x1448   : > { %v2429_v13 = vsub.f32 %v4120_v7, %v2426_v12  ;;  %v2427_v14 = vmul.f32 0.03125, %v2424_v2  ;;  %v2431_v15 = vmul.f32 %v2428_v0, %v2428_v0 }
0x144a   : > { %v2430_v16 = vsub.f32 %v4117_v42, %v2427_v14  ;;  %v2434_v17 = vsel %vm859_vm1, %v2431_v15, 0.0  ;;  %v2432_v18 = vmul.f32 %v2429_v13, %v2429_v13 }
0x144b   : > { %2435 = vadd.xlane.f32.xlu1 %v2434_v17 }
0x144c   : > { %v2437_v20 = vsel %vm859_vm1, %v2432_v18, 0.0  ;;  %v2433_v22 = vmul.f32 %v2430_v16, %v2430_v16 }
0x144d   : > { %2438 = vadd.xlane.f32.xlu0 %v2437_v20 }
0x144e   : > { %v2440_v23 = vsel %vm866_vm2, %v2433_v22, 0.0 }
0x144f   : > { %2441 = vadd.xlane.f32.xlu1 %v2440_v23  ;;  %v3126_v23 = vld [vmem:[%s4244_s15 + $0x1] ss:$0 sm:$0xff] }
0x14d8   : > { %v2436_v54 = vpop.xlane.xlu1 %2435 }
0x14d9   : > { %v2443_v29 = vmul.f32 0.03125, %v2436_v54 }
0x14da   : > { %v2439_v33 = vpop.xlane.xlu0 %2438 }
0x14db   : > { %v2446_v35 = vadd.f32 1e-12, %v2443_v29  ;;  %v2444_v36 = vmul.f32 0.03125, %v2439_v33 }
0x14dc   : > { %v2442_v37 = vpop.xlane.xlu1 %2441 }
0x14dd   : > { %3567 = vrsqrt.f32 %v2446_v35  ;;  %v2447_v38 = vadd.f32 1e-12, %v2444_v36  ;;  %v2445_v56 = vmul.f32 0.03125, %v2442_v37 }
0x14df   : > { %3569 = vrsqrt.f32 %v2447_v38  ;;  %v2448_v39 = vadd.f32 1e-12, %v2445_v56 }
0x14e1   : > { %3571 = vrsqrt.f32 %v2448_v39 }
0x14e7   : > { %v3568_v41 = vpop.eup %3567 }
0x14e8   : > { %v2452_v32 = vmul.f32 %v3568_v41, %v2428_v0 }
0x14e9   : > { %v3570_v34 = vpop.eup %3569 }
0x14ea   : > { %v2453_v21 = vmul.f32 %v3570_v34, %v2429_v13  ;;  %v2461_v44 = vmul.f32 %v3097_v31, %v2452_v32 }
0x14eb   : > { %v3572_v45 = vpop.eup %3571 }
0x14ec   : > { %v2454_v46 = vmul.f32 %v3572_v45, %v2430_v16  ;;  %v2462_v24 = vmul.f32 %v3097_v31, %v2453_v21  ;;  %v2470_v47 = vadd.f32 %v3098_v30, %v2461_v44 }
0x14ee   : > { %v2471_v48 = vadd.f32 %v3098_v30, %v2462_v24  ;;  %v2463_v49 = vmul.f32 %v3097_v31, %v2454_v46 }
0x14f0   : > { %v2480_v50 = vpack.c.bf16 %v2471_v48, %v2470_v47  ;;  %v2472_v51 = vadd.f32 %v3098_v30, %v2463_v49  ;;  %v3489_v49 = vld [vmem:[%s4247_s18] sm:$0xff]  }
0x14f1   : > { %3401 = vmatprep.subr.bf16.mxu0 %v3489_v49 }
0x14f2   : > { %3377 = vmatprep.mubr.msk.bf16.mxu0 %vm859_vm1, %v2480_v50  ;;  %v2481_v52 = vpack.c.bf16 %v2472_v51, %v2472_v51  ;;  %v3490_v50 = vld [vmem:[%s4247_s18 + $0x8] sm:$0xff]   ;;  %v3491_v51 = vld [vmem:[%s4249_s20] sm:$0xff]  }
0x14f4   : > { %3378 = vmatmul.mubr.msk.bf16.vlgmr.msra.gmra.mrb[32].mxu0 %vm859_vm1, %v2481_v52 }
0x14f5   : > { %3402 = vmatpush3.bf16.msra.mxu0 %v3489_v49 }
0x14f6   : > { %3403 = vmatprep.subr.bf16.mxu0 %v3490_v50 }
0x14f9   : > { %3404 = vmatpush3.bf16.msra.mxu0 %v3490_v50 }
0x14fa   : > { %3409 = vmatprep.subr.bf16.mxu0 %v3491_v51 }
0x15c7   : > { %v3379_v63 = vpop.f32.mrb[32].mxu0 }
0x15c8   : > { %v2549_v25 = vadd.f32 %v3379_v63, %v3104_v62  ;;  %v2540_v1 = vpop.f32.mrb[33].mxu0 }
0x15c9   : > { %v2541_v3 = vadd.f32 %v3104_v62, %v2540_v1  ;;  %v3380_v4 = vpop.f32.mrb[34].mxu0  ;;  %v3135_v1 = vld [vmem:[%s4245_s16] ss:$0 sm:$0xff] }
0x15ca   : > { %v2559_v40 = vmul.f32 0.70710677, %v2549_v25  ;;  %v2543_v6 = vpop.f32.mrb[35].mxu0  ;;  %v2556_v2 = vmul.f32 0.5, %v2549_v25 }
0x15cb   : > { %v2557_v43 = vmul.f32 0.70710677, %v2541_v3  ;;  %v2544_v8 = vadd.f32 %v3104_v62, %v2543_v6  ;;  %v2554_v13 = vmul.f32 0.5, %v2541_v3 }
0x15cc   : > { %3573 = verf.f32 %v2559_v40 }
0x15cd   : > { %3575 = verf.f32 %v2557_v43  ;;  %v2558_v9 = vmul.f32 0.70710677, %v2544_v8  ;;  %v2555_v14 = vmul.f32 0.5, %v2544_v8  ;;  %v3136_v8 = vld [vmem:[%s4246_s17] ss:$0 sm:$0xff] }
0x15cf   : > { %3577 = verf.f32 %v2558_v9 }
0x15d6   : > { %v3574_v19 = vpop.eup %3573 }
0x15d7   : > { %v3576_v10 = vpop.eup %3575  ;;  %v2565_v11 = vadd.f32 1.0, %v3574_v19 }
0x15d8   : > { %v2563_v0 = vadd.f32 1.0, %v3576_v10 }
0x15d9   : > { %v3578_v12 = vpop.eup %3577  ;;  %v2568_v16 = vmul.f32 %v2565_v11, %v2556_v2 }
0x15da   : > { %v2564_v15 = vadd.f32 1.0, %v3578_v12  ;;  %v2566_v17 = vmul.f32 %v2563_v0, %v2554_v13 }
0x15db   : > { %v2589_v22 = vpack.c.bf16 %v2568_v16, %v2568_v16  ;;  %v3494_v16 = vld [vmem:[%s4249_s20 + $0x18] sm:$0xff]  }
0x15dc   : > { %v2567_v18 = vmul.f32 %v2564_v15, %v2555_v14  ;;  %v3492_v14 = vld [vmem:[%s4249_s20 + $0x8] sm:$0xff]   ;;  %v3493_v15 = vld [vmem:[%s4249_s20 + $0x10] sm:$0xff]  }
0x15de   : > { %v2588_v20 = vpack.c.bf16 %v2567_v18, %v2566_v17  ;;  %v3137_v17 = vld [vmem:[%s4248_s19] ss:$0 sm:$0xff] }
0x15e0   : > { %3397 = vmatprep.mubr.bf16.mxu1 %v2588_v20 }
0x15e1   : > { %3398 = vmatmul.mubr.bf16.vlgmr.msra.gmra.mrb[40].mxu1 %v2589_v22 }
0x16b4   : > { %v3399_v26 = vpop.f32.mrb[40].mxu1 }
0x16b5   : > { %v2678_v27 = vpop.f32.mrb[41].mxu1  ;;  %v2687_v28 = vadd.f32 %v3399_v26, %v3126_v23 }
0x16b6   : > { %v2679_v59 = vadd.f32 %v3126_v23, %v2678_v27  ;;  %v3400_v54 = vpop.f32.mrb[42].mxu1 }
0x16b7   : > { %v2681_v29 = vpop.f32.mrb[43].mxu1  ;;  %v2694_v38 = vadd.f32 %v2687_v28, %v4117_v42 }
0x16b8   : > { %v2682_v33 = vadd.f32 %v3126_v23, %v2681_v29  ;;  %v2692_v35 = vadd.f32 %v2679_v59, %v4114_v5 }
0x16b9   : > { %v2703_v39 = vsel %vm866_vm2, %v2694_v38, 0.0 }
0x16ba   : > { %v2697_v36 = vsel %vm859_vm1, %v2692_v35, 0.0  ;;  %v2693_v37 = vadd.f32 %v2682_v33, %v4120_v7 }
0x16bb   : > { %2698 = vadd.xlane.f32.xlu0 %v2697_v36  ;;  %v3142_v36 = vld [vmem:[%s4250_s21] ss:$0 sm:$0xff] }
0x16bc   : > { %v2700_v56 = vsel %vm859_vm1, %v2693_v37, 0.0 }
0x16bd   : > { %2701 = vadd.xlane.f32.xlu1 %v2700_v56 }
0x16bf   : > { %2704 = vadd.xlane.f32.xlu0 %v2703_v39 }
0x1748   : > { %v2699_v41 = vpop.xlane.xlu0 %2698 }
0x1749   : > { %v2706_v31 = vmul.f32 0.03125, %v2699_v41 }
0x174a   : > { %v2702_v32 = vpop.xlane.xlu1 %2701 }
0x174b   : > { %v2709_v34 = vsub.f32 %v2692_v35, %v2706_v31  ;;  %v2707_v21 = vmul.f32 0.03125, %v2702_v32 }
0x174c   : > { %v2705_v44 = vpop.xlane.xlu0 %2704 }
0x174d   : > { %v2710_v5 = vsub.f32 %v2693_v37, %v2707_v21  ;;  %v2708_v45 = vmul.f32 0.03125, %v2705_v44  ;;  %v2712_v30 = vmul.f32 %v2709_v34, %v2709_v34 }
0x174f   : > { %v2711_v46 = vsub.f32 %v2694_v38, %v2708_v45  ;;  %v2715_v7 = vsel %vm859_vm1, %v2712_v30, 0.0  ;;  %v2713_v42 = vmul.f32 %v2710_v5, %v2710_v5 }
0x1750   : > { %2716 = vadd.xlane.f32.xlu1 %v2715_v7 }
0x1751   : > { %v2718_v24 = vsel %vm859_vm1, %v2713_v42, 0.0  ;;  %v2714_v47 = vmul.f32 %v2711_v46, %v2711_v46 }
0x1752   : > { %2719 = vadd.xlane.f32.xlu0 %v2718_v24 }
0x1753   : > { %v2721_v48 = vsel %vm866_vm2, %v2714_v47, 0.0 }
0x1754   : > { %2722 = vadd.xlane.f32.xlu1 %v2721_v48 }
0x17dd   : > { %v2717_v52 = vpop.xlane.xlu1 %2716 }
0x17de   : > { %v2724_v53 = vmul.f32 0.03125, %v2717_v52 }
0x17df   : > { %v2720_v55 = vpop.xlane.xlu0 %2719 }
0x17e0   : > { %v2727_v57 = vadd.f32 1e-12, %v2724_v53  ;;  %v2725_v58 = vmul.f32 0.03125, %v2720_v55 }
0x17e1   : > { %v2723_v60 = vpop.xlane.xlu1 %2722 }
0x17e2   : > { %3579 = vrsqrt.f32 %v2727_v57  ;;  %v2728_v61 = vadd.f32 1e-12, %v2725_v58  ;;  %v2726_v62 = vmul.f32 0.03125, %v2723_v60 }
0x17e4   : > { %3581 = vrsqrt.f32 %v2728_v61  ;;  %v2729_v63 = vadd.f32 1e-12, %v2726_v62 }
0x17e6   : > { %3583 = vrsqrt.f32 %v2729_v63 }
0x17ec   : > { %v3580_v25 = vpop.eup %3579 }
0x17ed   : > { %v2733_v3 = vmul.f32 %v3580_v25, %v2709_v34 }
0x17ee   : > { %v3582_v4 = vpop.eup %3581 }
0x17ef   : > { %v2734_v40 = vmul.f32 %v3582_v4, %v2710_v5  ;;  %v2742_v6 = vmul.f32 %v3135_v1, %v2733_v3 }
0x17f0   : > { %v3584_v43 = vpop.eup %3583 }
0x17f1   : > { %v2735_v9 = vmul.f32 %v3584_v43, %v2711_v46  ;;  %v2743_v19 = vmul.f32 %v3135_v1, %v2734_v40  ;;  %v2751_v11 = vadd.f32 %v3136_v8, %v2742_v6 }
0x17f3   : > { %v2744_v10 = vmul.f32 %v3135_v1, %v2735_v9  ;;  %v2752_v0 = vadd.f32 %v3136_v8, %v2743_v19 }
0x17f5   : > { %v2759_v12 = vpack.c.bf16 %v2752_v0, %v2751_v11  ;;  %v2753_v2 = vadd.f32 %v3136_v8, %v2744_v10 }
0x17f7   : > { %3405 = vmatprep.mubr.msk.bf16.mxu0 %vm859_vm1, %v2759_v12  ;;  %v2760_v13 = vpack.c.bf16 %v2753_v2, %v2753_v2 }
0x17f9   : > { %3406 = vmatmul.mubr.msk.bf16.vlgmr.msra.gmra.mrb[36].mxu0 %vm859_vm1, %v2760_v13 }
0x17fa   : > { %3410 = vmatpush3.bf16.msra.mxu0 %v3491_v51 }
0x17fb   : > { %3411 = vmatprep.subr.bf16.mxu0 %v3492_v14 }
0x17fe   : > { %3412 = vmatpush3.bf16.msra.mxu0 %v3492_v14 }
0x17ff   : > { %3413 = vmatprep.subr.bf16.mxu0 %v3493_v15 }
0x1802   : > { %3414 = vmatpush3.bf16.msra.mxu0 %v3493_v15 }
0x1803   : > { %3415 = vmatprep.subr.bf16.mxu0 %v3494_v16 }
0x1806   : > { %3416 = vmatpush3.bf16.msra.mxu0 %v3494_v16 }
0x18cc   : > { %v3407_v18 = vpop.f32.mrb[36].mxu0 }
0x18cd   : > { %v2828_v20 = vadd.f32 %v3407_v18, %v3137_v17  ;;  %v2819_v22 = vpop.f32.mrb[37].mxu0 }
0x18ce   : > { %v2820_v23 = vadd.f32 %v3137_v17, %v2819_v22  ;;  %v3408_v26 = vpop.f32.mrb[38].mxu0 }
0x18cf   : > { %v2822_v27 = vpop.f32.mrb[39].mxu0  ;;  %v2835_v59 = vmax.f32 %v2828_v20, 0.0 }
0x18d0   : > { %v2823_v28 = vadd.f32 %v3137_v17, %v2822_v27  ;;  %v2833_v54 = vmax.f32 %v2820_v23, 0.0 }
0x18d1   : > { %v2846_v35 = vpack.c.bf16 %v2835_v59, %v2835_v59 }
0x18d2   : > { %v2834_v29 = vmax.f32 %v2823_v28, 0.0 }
0x18d4   : > { %v2845_v33 = vpack.c.bf16 %v2834_v29, %v2833_v54 }
0x18d6   : > { %3417 = vmatprep.mubr.msk.bf16.mxu0 %vm802_vm0, %v2845_v33 }
0x18d7   : > { %3418 = vmatmul.mubr.msk.bf16.vlgmr.msra.gmra.mrb[40].mxu0 %vm802_vm0, %v2846_v35 }
0x19aa   : > { %v3419_v37 = vpop.f32.mrb[40].mxu0 }
0x19ab   : > { %v2926_v38 = vadd.f32 %v3419_v37, %v3142_v36  ;;  %v2917_v56 = vpop.f32.mrb[41].mxu0 }
0x19ac   : > { %v2918_v39 = vadd.f32 %v3142_v36, %v2917_v56  ;;  %v3420_v41 = vpop.f32.mrb[42].mxu0 }
0x19ad   : > { %2933 = vst [vmem:[%s683_s24 + $0x10] sm:$0x1] %v2926_v38  ;;  %v2920_v31 = vpop.f32.mrb[43].mxu0 }
0x19ae   : > { %2931 = vst [vmem:[%s683_s24] sm:$0xff] %v2918_v39  ;;  %v2921_v32 = vadd.f32 %v3142_v36, %v2920_v31 }
0x19b0   : > { %2932 = vst [vmem:[%s683_s24 + $0x8] sm:$0xff] %v2921_v32 }
0x19b1 PF: > { %s32_s3 = sadd.s32 1, %s3591_s3  }
0x19b2   : > { %p29_p4 = scmp.ge.s32.totalorder %s32_s3, 4  }
0x19b4   :  { %31 = sbr.rel (!%p29_p4) target bundleno = 8 (0x8), region = 153 }

</bundles_post_ra>
